<compile_context>
chip_gen: v5e
topology: v5e:2x2
jax: 0.10.0
libtpu: 0.0.40
codegen_flags: <defaults>
</compile_context>

<pallas_src>
import functools

import jax
import jax.numpy as jnp
from jax.experimental import pallas as pl
from jax.experimental.pallas import tpu as pltpu

# ---------------- model hyperparameters (consistent with the module) --------
N_FEATURES = 16
NEUMISS_DEPTH = 3
MLP_DEPTH = 2          # -> Linear(F,W)+ReLU, Linear(W,W)+ReLU, Linear(W,1)
MLP_WIDTH = 32
BATCH = 256            # small demo batch
DTYPE = jnp.float32
SLAB_LANES = 128       # packed-parameter slab lane width (one vreg lane group)


# ---------------- device-aware configuration --------------------------------
def _num_tensorcores() -> int:
    """2 on v7x (so the 'parallel' batch axis feeds both TCs), else 1."""
    try:
        kind = jax.devices()[0].device_kind.lower()
    except Exception:
        return 1
    return 2 if "v7" in kind else 1


def _use_bf16_dots() -> bool:
    """bf16 MXU inputs on v6e / v7x (native bf16 MXU); keep f32 elsewhere."""
    try:
        kind = jax.devices()[0].device_kind.lower()
    except Exception:
        return False
    return ("v6" in kind) or ("v7" in kind)


def _choose_batch_tiling(batch: int) -> tuple[int, int]:
    """Return (batch_tile, num_grid_steps).

    One grid step per available TensorCore (feedback: per-step overhead ~0.35us
    dwarfs the compute here).  When gridding, the batch tile (second-minor axis
    of the x block) must be a multiple of 8.
    """
    n = _num_tensorcores()
    if n <= 1 or batch < 2 * 8:
        return batch, 1                       # block == full array: no constraints
    tb = -(-batch // n)                       # ceil
    tb = ((tb + 7) // 8) * 8                  # sublane-align
    return tb, n


# ---------------- kernel -----------------------------------------------------
def _neumiss_mlp_kernel(x_ref, w_ref, bl_ref, out_ref, *,
                        n_features, mlp_width, neumiss_depth,
                        wn_r, w0_r, w1_r, mu_r, b0_r, b1_r, wl_r,
                        bf16_dots):
    """Forward for one batch tile in natural (TB, F) layout (batch on sublanes)."""
    F, W = n_features, mlp_width
    dot_dt = jnp.bfloat16 if bf16_dots else jnp.float32

    x = x_ref[...]                                       # (TB, F), may contain NaN
    mask = jnp.isnan(x)                                  # True where value missing
    nm = jnp.logical_not(mask).astype(jnp.float32)       # (~mask) as float
    xc = jnp.where(mask, jnp.zeros_like(x), x)           # torch.nan_to_num

    mu = w_ref[mu_r:mu_r + 1, 0:F]                       # (1, F)
    h0 = xc - nm * mu                                    # (TB, F)

    # NeuMiss iterations: h <- (~mask) * (h @ Wn^T) + h0   (static unroll)
    wnT = w_ref[wn_r:wn_r + F, 0:F].astype(dot_dt)       # (F, F) = Wn^T
    h = h0
    for _ in range(neumiss_depth):
        h = nm * jnp.dot(h.astype(dot_dt), wnT,
                         preferred_element_type=jnp.float32) + h0

    # MLP head: a = relu(h @ W^T + b)
    w0T = w_ref[w0_r:w0_r + F, 0:W].astype(dot_dt)       # (F, W)
    b0 = w_ref[b0_r:b0_r + 1, 0:W]                       # (1, W)
    a = jnp.dot(h.astype(dot_dt), w0T, preferred_element_type=jnp.float32) + b0
    a = jnp.maximum(a, 0.0)

    w1T = w_ref[w1_r:w1_r + W, 0:W].astype(dot_dt)       # (W, W)
    b1 = w_ref[b1_r:b1_r + 1, 0:W]                       # (1, W)
    a = jnp.dot(a.astype(dot_dt), w1T, preferred_element_type=jnp.float32) + b1
    a = jnp.maximum(a, 0.0)

    # Final Linear(W, 1): VPU multiply + cross-lane reduce instead of a
    # 1-row MXU matmul; scalar bias comes from SMEM on the scalar path.
    wl = w_ref[wl_r:wl_r + 1, 0:W]                       # (1, W)
    out = jnp.sum(a * wl, axis=1, keepdims=True) + bl_ref[0, 0]   # (TB, 1)
    out_ref[...] = out.astype(out_ref.dtype)


# ---------------- parameter packing ------------------------------------------
def pack_params(params):
    """Pack the 8 small parameters into one (rows, 128) f32 VMEM slab.

    Weights are transposed here (once, outside the kernel), so the kernel's
    matmuls need no in-kernel transposes.  Returns (slab, bias_scalar, cfg).
    """
    mu, wn, w0, b0, w1, b1, wl, bl = params
    F = mu.shape[0]
    W = w0.shape[0]
    assert max(F, W) <= SLAB_LANES

    wn_r = 0
    w0_r = wn_r + F
    w1_r = w0_r + F
    mu_r = w1_r + W
    b0_r = mu_r + 1
    b1_r = b0_r + 1
    wl_r = b1_r + 1
    rows = ((wl_r + 1 + 7) // 8) * 8                     # sublane-align

    slab = jnp.zeros((rows, SLAB_LANES), DTYPE)
    slab = slab.at[wn_r:wn_r + F, 0:F].set(wn.T)         # Wn^T (in, out)
    slab = slab.at[w0_r:w0_r + F, 0:W].set(w0.T)         # W0^T
    slab = slab.at[w1_r:w1_r + W, 0:W].set(w1.T)         # W1^T
    slab = slab.at[mu_r, 0:F].set(mu)
    slab = slab.at[b0_r, 0:W].set(b0)
    slab = slab.at[b1_r, 0:W].set(b1)
    slab = slab.at[wl_r, 0:W].set(wl.reshape(-1))

    cfg = dict(F=F, W=W, wn_r=wn_r, w0_r=w0_r, w1_r=w1_r,
               mu_r=mu_r, b0_r=b0_r, b1_r=b1_r, wl_r=wl_r)
    return slab, bl.reshape(1, 1).astype(DTYPE), cfg


# ---------------- wrapper -----------------------------------------------------
def neumiss_mlp_forward(x, slab, bl, cfg, *, neumiss_depth=NEUMISS_DEPTH,
                        bf16_dots=None):
    """Forward on x of shape (B, F) in its natural layout; returns (B,)."""
    if bf16_dots is None:
        bf16_dots = _use_bf16_dots()
    B, F = x.shape
    assert F == cfg["F"]

    TB, n_steps = _choose_batch_tiling(B)
    Bp = TB * n_steps
    if Bp != B:
        # Zero pad rows (finite garbage in the padded outputs, sliced off below).
        x = jnp.pad(x, ((0, Bp - B), (0, 0)))

    kern = functools.partial(
        _neumiss_mlp_kernel,
        n_features=cfg["F"], mlp_width=cfg["W"], neumiss_depth=neumiss_depth,
        bf16_dots=bf16_dots,
        wn_r=cfg["wn_r"], w0_r=cfg["w0_r"], w1_r=cfg["w1_r"],
        mu_r=cfg["mu_r"], b0_r=cfg["b0_r"], b1_r=cfg["b1_r"], wl_r=cfg["wl_r"])

    out = pl.pallas_call(
        kern,
        grid=(n_steps,),
        out_shape=jax.ShapeDtypeStruct((Bp, 1), DTYPE),
        in_specs=[
            pl.BlockSpec((TB, F), lambda i: (i, 0)),              # x tile (streamed)
            pl.BlockSpec(slab.shape, lambda i: (0, 0)),           # packed params (resident)
            pl.BlockSpec((1, 1), lambda i: (0, 0),
                         memory_space=pltpu.MemorySpace.SMEM),    # output bias (scalar)
        ],
        out_specs=pl.BlockSpec((TB, 1), lambda i: (i, 0)),
        # Tiny per-tile footprint (<1 MiB) -> no vmem_limit_bytes override needed,
        # even on v7x's 64 MiB VMEM.
        compiler_params=pltpu.CompilerParams(
            dimension_semantics=("parallel",)),                   # v7x: 2 TCs split batch
    )(x, slab, bl)

    out = out.reshape(Bp)
    # Matches torch .squeeze() for B > 1 (B == 1 would give shape (1,) not 0-d).
    return out[:B] if Bp != B else out


# ---------------- init + pure-JAX reference ----------------------------------
def init_params(key):
    """Deterministic parameter init mirroring the module's shapes (PyTorch layout)."""
    k = jax.random.split(key, 8)
    F, W = N_FEATURES, MLP_WIDTH

    mu = jax.random.normal(k[0], (F,), DTYPE)

    bound_n = 0.5 * (6.0 / (F + F)) ** 0.5               # xavier_uniform, gain=0.5
    wn = jax.random.uniform(k[1], (F, F), DTYPE, -bound_n, bound_n)

    def lin(kw, kb, fan_out, fan_in):
        bound = (1.0 / fan_in) ** 0.5                    # ~PyTorch default Linear init
        w = jax.random.uniform(kw, (fan_out, fan_in), DTYPE, -bound, bound)
        b = jax.random.uniform(kb, (fan_out,), DTYPE, -bound, bound)
        return w, b

    w0, b0 = lin(k[2], k[3], W, F)
    w1, b1 = lin(k[4], k[5], W, W)
    wl, bl = lin(k[6], k[7], 1, W)

    return (mu, wn, w0, b0, w1, b1, wl, bl)


def _reference_forward(x, params, *, neumiss_depth=NEUMISS_DEPTH,
                       dot_dtype=jnp.float32):
    """Pure-JAX reference in (B, F) layout (PyTorch semantics).

    `dot_dtype` mirrors the kernel's MXU input dtype so the comparison is tight
    in both the f32 and bf16-dot configurations (accumulation stays f32).
    """
    mu, wn, w0, b0, w1, b1, wl, bl = params
    dd = lambda a, b: jnp.dot(a.astype(dot_dtype), b.astype(dot_dtype),
                              preferred_element_type=jnp.float32)
    mask = jnp.isnan(x)
    nm = jnp.logical_not(mask).astype(jnp.float32)
    xc = jnp.where(mask, 0.0, x)
    h0 = xc - nm * mu[None, :]
    h = h0
    for _ in range(neumiss_depth):
        h = nm * dd(h, wn.T) + h0
    a = jnp.maximum(dd(h, w0.T) + b0[None, :], 0.0)
    a = jnp.maximum(dd(a, w1.T) + b1[None, :], 0.0)
    out = a @ wl.T + bl[None, :]                         # final layer in f32 (as in kernel)
    return out.reshape(-1)


if __name__ == "__main__":
    key = jax.random.PRNGKey(0)
    k_x, k_m, k_p = jax.random.split(key, 3)

    # Input with deterministic missing values (NaNs), shape (BATCH, N_FEATURES)
    x = jax.random.normal(k_x, (BATCH, N_FEATURES), DTYPE)
    missing = jax.random.bernoulli(k_m, 0.3, (BATCH, N_FEATURES))
    x = jnp.where(missing, jnp.nan, x)

    params = init_params(k_p)
    slab, bl, cfg = pack_params(params)                  # pack/transpose once, off the hot path

    bf16 = _use_bf16_dots()
    fwd = jax.jit(lambda xx: neumiss_mlp_forward(xx, slab, bl, cfg, bf16_dots=bf16))
    out = jax.block_until_ready(fwd(x))

    assert out.shape == (BATCH,), out.shape
    assert bool(jnp.all(jnp.isfinite(out))), "non-finite output"

    # Check vs pure-JAX reference (same MXU input dtype; loose tolerance absorbs
    # MXU multi-pass / accumulation-order rounding differences).
    ref = _reference_forward(x, params,
                             dot_dtype=jnp.bfloat16 if bf16 else jnp.float32)
    max_err = float(jnp.max(jnp.abs(out - ref)))
    assert max_err < 5e-2, f"mismatch vs reference: {max_err}"

    print("KERNEL_OK")
</pallas_src>

<mosaic_0001>
module attributes {stable_mosaic.version = 11 : i64} {
  func.func @_neumiss_mlp_kernel(%arg0: i32, %arg1: memref<256x16xf32, #tpu.memory_space<vmem>>, %arg2: memref<72x128xf32, #tpu.memory_space<vmem>>, %arg3: memref<1x1xf32, #tpu.memory_space<smem>>, %arg4: memref<256x1xf32, #tpu.memory_space<vmem>>) attributes {dimension_semantics = [#tpu.dimension_semantics<parallel>], iteration_bounds = array<i64: 1>, scalar_prefetch = 0 : i64, scratch_operands = 0 : i64, tpu.core_type = #tpu.core_type<tc>, window_params = [{transform_indices = @transform_0, window_bounds = array<i64: 256, 16>}, {pipeline_mode = #tpu.pipeline_mode<synchronous>, transform_indices = @transform_1, window_bounds = array<i64: 72, 128>}, {transform_indices = @transform_2, window_bounds = array<i64: 1, 1>}, {transform_indices = @transform_3, window_bounds = array<i64: 256, 1>}]} {
    %c0 = arith.constant 0 : index
    %c0_0 = arith.constant 0 : index
    %0 = vector.load %arg1[%c0, %c0_0] : memref<256x16xf32, #tpu.memory_space<vmem>>, vector<256x16xf32>
    %1 = arith.cmpf one, %0, %0 : vector<256x16xf32>
    %cst = arith.constant dense<true> : vector<256x16xi1>
    %2 = arith.xori %1, %cst : vector<256x16xi1>
    %3 = arith.extui %2 : vector<256x16xi1> to vector<256x16xi32>
    %4 = arith.sitofp %3 : vector<256x16xi32> to vector<256x16xf32>
    %cst_1 = arith.constant 0.000000e+00 : f32
    %5 = vector.broadcast %cst_1 : f32 to vector<256x16xf32>
    %6 = arith.select %1, %5, %0 : vector<256x16xi1>, vector<256x16xf32>
    %c64 = arith.constant 64 : index
    %c0_2 = arith.constant 0 : index
    %7 = vector.load %arg2[%c64, %c0_2] : memref<72x128xf32, #tpu.memory_space<vmem>>, vector<1x16xf32>
    %8 = vector.broadcast %7 : vector<1x16xf32> to vector<256x16xf32>
    %9 = arith.mulf %4, %8 : vector<256x16xf32>
    %10 = arith.subf %6, %9 : vector<256x16xf32>
    %c0_3 = arith.constant 0 : index
    %c0_4 = arith.constant 0 : index
    %11 = vector.load %arg2[%c0_3, %c0_4] : memref<72x128xf32, #tpu.memory_space<vmem>>, vector<16x16xf32>
    %cst_5 = arith.constant dense<0.000000e+00> : vector<256x16xf32>
    %12 = tpu.matmul %10, %11, %cst_5 {dimension_numbers = #tpu.dot_dimension_numbers<[1], [0], [0], [1], [0, 0, 1, 1], [], []>} : vector<256x16xf32>, vector<16x16xf32>, vector<256x16xf32> -> vector<256x16xf32>
    %13 = arith.mulf %4, %12 : vector<256x16xf32>
    %14 = arith.addf %13, %10 : vector<256x16xf32>
    %cst_6 = arith.constant dense<0.000000e+00> : vector<256x16xf32>
    %15 = tpu.matmul %14, %11, %cst_6 {dimension_numbers = #tpu.dot_dimension_numbers<[1], [0], [0], [1], [0, 0, 1, 1], [], []>} : vector<256x16xf32>, vector<16x16xf32>, vector<256x16xf32> -> vector<256x16xf32>
    %16 = arith.mulf %4, %15 : vector<256x16xf32>
    %17 = arith.addf %16, %10 : vector<256x16xf32>
    %cst_7 = arith.constant dense<0.000000e+00> : vector<256x16xf32>
    %18 = tpu.matmul %17, %11, %cst_7 {dimension_numbers = #tpu.dot_dimension_numbers<[1], [0], [0], [1], [0, 0, 1, 1], [], []>} : vector<256x16xf32>, vector<16x16xf32>, vector<256x16xf32> -> vector<256x16xf32>
    %19 = arith.mulf %4, %18 : vector<256x16xf32>
    %20 = arith.addf %19, %10 : vector<256x16xf32>
    %c16 = arith.constant 16 : index
    %c0_8 = arith.constant 0 : index
    %21 = vector.load %arg2[%c16, %c0_8] : memref<72x128xf32, #tpu.memory_space<vmem>>, vector<16x32xf32>
    %c65 = arith.constant 65 : index
    %c0_9 = arith.constant 0 : index
    %22 = vector.load %arg2[%c65, %c0_9] : memref<72x128xf32, #tpu.memory_space<vmem>>, vector<1x32xf32>
    %cst_10 = arith.constant dense<0.000000e+00> : vector<256x32xf32>
    %23 = tpu.matmul %20, %21, %cst_10 {dimension_numbers = #tpu.dot_dimension_numbers<[1], [0], [0], [1], [0, 0, 1, 1], [], []>} : vector<256x16xf32>, vector<16x32xf32>, vector<256x32xf32> -> vector<256x32xf32>
    %24 = vector.broadcast %22 : vector<1x32xf32> to vector<256x32xf32>
    %25 = arith.addf %23, %24 : vector<256x32xf32>
    %cst_11 = arith.constant 0.000000e+00 : f32
    %26 = vector.broadcast %cst_11 : f32 to vector<256x32xf32>
    %27 = arith.maximumf %25, %26 : vector<256x32xf32>
    %c32 = arith.constant 32 : index
    %c0_12 = arith.constant 0 : index
    %28 = vector.load %arg2[%c32, %c0_12] : memref<72x128xf32, #tpu.memory_space<vmem>>, vector<32x32xf32>
    %c66 = arith.constant 66 : index
    %c0_13 = arith.constant 0 : index
    %29 = vector.load %arg2[%c66, %c0_13] : memref<72x128xf32, #tpu.memory_space<vmem>>, vector<1x32xf32>
    %cst_14 = arith.constant dense<0.000000e+00> : vector<256x32xf32>
    %30 = tpu.matmul %27, %28, %cst_14 {dimension_numbers = #tpu.dot_dimension_numbers<[1], [0], [0], [1], [0, 0, 1, 1], [], []>} : vector<256x32xf32>, vector<32x32xf32>, vector<256x32xf32> -> vector<256x32xf32>
    %31 = vector.broadcast %29 : vector<1x32xf32> to vector<256x32xf32>
    %32 = arith.addf %30, %31 : vector<256x32xf32>
    %cst_15 = arith.constant 0.000000e+00 : f32
    %33 = vector.broadcast %cst_15 : f32 to vector<256x32xf32>
    %34 = arith.maximumf %32, %33 : vector<256x32xf32>
    %c67 = arith.constant 67 : index
    %c0_16 = arith.constant 0 : index
    %35 = vector.load %arg2[%c67, %c0_16] : memref<72x128xf32, #tpu.memory_space<vmem>>, vector<1x32xf32>
    %36 = vector.broadcast %35 : vector<1x32xf32> to vector<256x32xf32>
    %37 = arith.mulf %34, %36 : vector<256x32xf32>
    %cst_17 = arith.constant dense<0.000000e+00> : vector<256xf32>
    %38 = vector.multi_reduction <add>, %37, %cst_17 [1] : vector<256x32xf32> to vector<256xf32>
    %39 = vector.shape_cast %38 : vector<256xf32> to vector<256x1xf32>
    %c0_18 = arith.constant 0 : index
    %c0_19 = arith.constant 0 : index
    %40 = memref.load %arg3[%c0_18, %c0_19] : memref<1x1xf32, #tpu.memory_space<smem>>
    %41 = vector.broadcast %40 : f32 to vector<256x1xf32>
    %42 = arith.addf %39, %41 : vector<256x1xf32>
    %c0_20 = arith.constant 0 : index
    %c0_21 = arith.constant 0 : index
    %43 = vector.load %arg4[%c0_20, %c0_21] : memref<256x1xf32, #tpu.memory_space<vmem>>, vector<256x1xf32>
    tpu.vector_store %arg4[%c0_20, %c0_21], %42 {strides = array<i32>} : memref<256x1xf32, #tpu.memory_space<vmem>>, vector<256x1xf32>,
    return
  }
  func.func @transform_0(%arg0: i32) -> (i32, i32) {
    %c0_i32 = arith.constant 0 : i32
    %c0_i32_0 = arith.constant 0 : i32
    return %arg0, %c0_i32 : i32, i32
  }
  func.func @transform_1(%arg0: i32) -> (i32, i32) {
    %c0_i32 = arith.constant 0 : i32
    %c0_i32_0 = arith.constant 0 : i32
    %c0_i32_1 = arith.constant 0 : i32
    return %c0_i32, %c0_i32_0 : i32, i32
  }
  func.func @transform_2(%arg0: i32) -> (i32, i32) {
    %c0_i32 = arith.constant 0 : i32
    %c0_i32_0 = arith.constant 0 : i32
    %c0_i32_1 = arith.constant 0 : i32
    return %c0_i32, %c0_i32_0 : i32, i32
  }
  func.func @transform_3(%arg0: i32) -> (i32, i32) {
    %c0_i32 = arith.constant 0 : i32
    %c0_i32_0 = arith.constant 0 : i32
    return %arg0, %c0_i32 : i32, i32
  }
}

</mosaic_0001>

<bundles_post_ra>
// kernel: _lambda_.1
= control target key start
LH: loop header
LB: loop body
LE: loop exit
PB: predicated region body
PF: predicated region fallthrough
CT: control target
= control target key end

     0   :  { %vm1993_vm2 = vmmov 1   ;;  %v3112_v5 = vmov 0.0   ;;  %vm275_vm5 = vcmask 130048   ;;  %s3106_s1 = inlined_call_operand.vmem [shape: f32[72,128], index: 1, kind: input, shape index: {}]   ;;  %s3107_s0 = inlined_call_operand.vmem [shape: f32[256,16], index: 0, kind: input, shape index: {}]   ;;  %s3108_s2 = inlined_call_operand.<no memory space> [shape: f32[1,1], index: 2, kind: input, shape index: {}]   ;;  %s3109_s3 = inlined_call_operand.vmem [shape: f32[256,1], index: 3, kind: output, shape index: {}]  }
   0x1   :  { %v274_v0 = vld [vmem:[%s3106_s1 + $0x8] sm:$0xff]  ;;  %v2021_v1 = vld [vmem:[%s3106_s1 + $0x40] ss:$0 sm:$0xff]  ;;  %v17_v9 = vld [vmem:[%s3107_s0 + $0x10] sm:$0xff] }
   0x2   :  { %386 = vmatpush.msra.mxu0 %v274_v0  ;;  %1981 = vmatpush.msra.mxu1 %v274_v0  ;;  %v273_v2 = vld [vmem:[%s3106_s1] sm:$0xff]  ;;  %v16_v4 = vld [vmem:[%s3107_s0 + $0x8] sm:$0xff]  ;;  %vm49_vm6 = vcmp.ne.f32.partialorder %v17_v9, %v17_v9  ;;  %v18_v15 = vld [vmem:[%s3107_s0 + $0x18] sm:$0xff] }
   0x3   :  { %1982 = vmatpush.msra.mxu2 %v274_v0  ;;  %1983 = vmatpush.msra.mxu3 %v274_v0  ;;  %v15_v3 = vld [vmem:[%s3107_s0] sm:$0xff]  ;;  %vm48_vm1 = vcmp.ne.f32.partialorder %v16_v4, %v16_v4  ;;  %vm81_vm7 = vmxor %vm49_vm6, %vm1993_vm2  ;;  %vm50_vm8 = vcmp.ne.f32.partialorder %v18_v15, %v18_v15  ;;  %v177_v18 = vsel %vm49_vm6, 0.0, %v17_v9  ;;  %v20_v24 = vld [vmem:[%s3107_s0 + $0x28] sm:$0xff] }
   0x4   :  { %387 = vmatpush.msra.mxu0 %v273_v2  ;;  %vm47_vm0 = vcmp.ne.f32.partialorder %v15_v3, %v15_v3  ;;  %1984 = vmatpush.msra.mxu1 %v273_v2  ;;  %vm80_vm4 = vmxor %vm48_vm1, %vm1993_vm2  ;;  %v176_v13 = vsel %vm48_vm1, 0.0, %v16_v4  ;;  %v2060_v16 = vsel %vm81_vm7, 1.0, %v3112_v5  ;;  %v19_v20 = vld [vmem:[%s3107_s0 + $0x20] sm:$0xff]  ;;  %v178_v23 = vsel %vm50_vm8, 0.0, %v18_v15  ;;  %v24_v29 = vld [vmem:[%s3107_s0 + $0x48] sm:$0xff] }
   0x5   :  { %vm79_vm3 = vmxor %vm47_vm0, %vm1993_vm2  ;;  %1985 = vmatpush.msra.mxu2 %v273_v2  ;;  %v175_v7 = vsel %vm47_vm0, 0.0, %v15_v3  ;;  %1986 = vmatpush.msra.mxu3 %v273_v2  ;;  %v2044_v10 = vsel %vm80_vm4, 1.0, %v3112_v5  ;;  %v211_v17 = vmul.f32 %v2021_v1, %v2060_v16  ;;  %vm51_vm10 = vcmp.ne.f32.partialorder %v19_v20, %v19_v20  ;;  %v23_v28 = vld [vmem:[%s3107_s0 + $0x40] sm:$0xff]  ;;  %v21_v31 = vld [vmem:[%s3107_s0 + $0x30] sm:$0xff] }
   0x6   :  { %659 = vmatpush.msrb.mxu1 %v274_v0  ;;  %v2034_v6 = vsel %vm79_vm3, 1.0, %v3112_v5  ;;  %v210_v12 = vmul.f32 %v2021_v1, %v2044_v10  ;;  %vm82_vm9 = vmxor %vm50_vm8, %vm1993_vm2  ;;  %vm52_vm12 = vcmp.ne.f32.partialorder %v20_v24, %v20_v24  ;;  %v179_v30 = vsel %vm51_vm10, 0.0, %v19_v20  ;;  %v25_v36 = vld [vmem:[%s3107_s0 + $0x50] sm:$0xff]  ;;  %v22_v44 = vld [vmem:[%s3107_s0 + $0x38] sm:$0xff] }
   0x7   :  { %932 = vmatpush.msrb.mxu2 %v274_v0  ;;  %v209_v8 = vmul.f32 %v2021_v1, %v2034_v6  ;;  %v2067_v19 = vsub.f32 %v177_v18, %v211_v17  ;;  %v2073_v21 = vsel %vm82_vm9, 1.0, %v3112_v5  ;;  %vm83_vm11 = vmxor %vm51_vm10, %vm1993_vm2  ;;  %vm55_vm14 = vcmp.ne.f32.partialorder %v23_v28, %v23_v28  ;;  %v26_v47 = vld [vmem:[%s3107_s0 + $0x58] sm:$0xff]  ;;  %v27_v56 = vld [vmem:[%s3107_s0 + $0x60] sm:$0xff] }
   0x8   :  { %660 = vmatpush.msrb.mxu1 %v273_v2  ;;  %v2054_v14 = vsub.f32 %v176_v13, %v210_v12  ;;  %v212_v22 = vmul.f32 %v2021_v1, %v2073_v21  ;;  %v2086_v26 = vsel %vm83_vm11, 1.0, %v3112_v5  ;;  %vm84_vm13 = vmxor %vm52_vm12, %vm1993_vm2  ;;  %vm56_vm15 = vcmp.ne.f32.partialorder %v24_v29, %v24_v29  ;;  %v28_v63 = vld [vmem:[%s3107_s0 + $0x68] sm:$0xff]  ;;  %v29_v15 = vld [vmem:[%s3107_s0 + $0x70] sm:$0xff] }
   0x9   :  { %933 = vmatpush.msrb.mxu2 %v273_v2  ;;  %v2046_v11 = vsub.f32 %v175_v7, %v209_v8  ;;  %v213_v27 = vmul.f32 %v2021_v1, %v2086_v26  ;;  %vm87_vm0 = vmxor %vm55_vm14, %vm1993_vm2  ;;  %v183_v33 = vsel %vm55_vm14, 0.0, %v23_v28  ;;  %v2117_v37 = vsel %vm84_vm13, 1.0, %v3112_v5  ;;  %v31_v7 = vld [vmem:[%s3107_s0 + $0x80] sm:$0xff] }
   0xa   :  { %v2083_v25 = vsub.f32 %v178_v23, %v212_v22  ;;  %v2105_v32 = vsel %vm87_vm0, 1.0, %v3112_v5  ;;  %vm88_vm1 = vmxor %vm56_vm15, %vm1993_vm2  ;;  %vm53_vm3 = vcmp.ne.f32.partialorder %v21_v31, %v21_v31  ;;  %vm57_vm4 = vcmp.ne.f32.partialorder %v25_v36, %v25_v36 }
   0xb   :  { %1821 = vmatmul.msk.f32.vlgmr.msra.gmra.mxu0 %vm275_vm5, %v2046_v11  ;;  %v2109_v34 = vsub.f32 %v179_v30, %v213_v27  ;;  %v217_v35 = vmul.f32 %v2021_v1, %v2105_v32  ;;  %v2120_v38 = vsel %vm88_vm1, 1.0, %v3112_v5  ;;  %v214_v40 = vmul.f32 %v2021_v1, %v2117_v37  ;;  %vm85_vm6 = vmxor %vm53_vm3, %vm1993_vm2  ;;  %v30_v27 = vld [vmem:[%s3107_s0 + $0x78] sm:$0xff] }
   0xc   :  { %3149 = vst [vmem:[#allocation3_spill] sm:$0xff] %v2120_v38  ;;  %v218_v41 = vmul.f32 %v2021_v1, %v2120_v38  ;;  %v180_v42 = vsel %vm52_vm12, 0.0, %v20_v24  ;;  %v184_v43 = vsel %vm56_vm15, 0.0, %v24_v29  ;;  %vm89_vm7 = vmxor %vm57_vm4, %vm1993_vm2  ;;  %v2149_v48 = vsel %vm85_vm6, 1.0, %v3112_v5 }
   0xd   :  { %v2122_v39 = vsub.f32 %v183_v33, %v217_v35  ;;  %v2141_v45 = vsub.f32 %v180_v42, %v214_v40  ;;  %v2152_v49 = vsel %vm89_vm7, 1.0, %v3112_v5  ;;  %vm54_vm8 = vcmp.ne.f32.partialorder %v22_v44, %v22_v44 }
   0xe   :  { %v2143_v46 = vsub.f32 %v184_v43, %v218_v41  ;;  %3152 = vst [vmem:[#allocation6_spill] sm:$0xff] %v2152_v49  ;;  %vm58_vm9 = vcmp.ne.f32.partialorder %v26_v47, %v26_v47  ;;  %v215_v50 = vmul.f32 %v2021_v1, %v2149_v48  ;;  %v219_v51 = vmul.f32 %v2021_v1, %v2152_v49  ;;  %vm86_vm10 = vmxor %vm54_vm8, %vm1993_vm2  ;;  %v32_v41 = vld [vmem:[%s3107_s0 + $0x88] sm:$0xff] }
   0xf   :  { %3150 = vst [vmem:[#allocation4_spill] sm:$0xff] %v2122_v39  ;;  %1829 = vmatmul.msk.f32.vlgmr.msra.gmra.mxu1 %vm275_vm5, %v2122_v39  ;;  %v181_v52 = vsel %vm53_vm3, 0.0, %v21_v31  ;;  %v185_v53 = vsel %vm57_vm4, 0.0, %v25_v36  ;;  %vm90_vm11 = vmxor %vm58_vm9, %vm1993_vm2  ;;  %v2176_v57 = vsel %vm86_vm10, 1.0, %v3112_v5  ;;  %vm59_vm12 = vcmp.ne.f32.partialorder %v27_v56, %v27_v56 }
  0x10   :  { %3151 = vst [vmem:[#allocation5_spill] sm:$0xff] %v2143_v46  ;;  %v2168_v54 = vsub.f32 %v181_v52, %v215_v50  ;;  %v2170_v55 = vsub.f32 %v185_v53, %v219_v51  ;;  %v2179_v58 = vsel %vm90_vm11, 1.0, %v3112_v5  ;;  %v216_v59 = vmul.f32 %v2021_v1, %v2176_v57  ;;  %vm91_vm13 = vmxor %vm59_vm12, %vm1993_vm2  ;;  %v33_v50 = vld [vmem:[%s3107_s0 + $0x90] sm:$0xff] }
  0x11   :  { %3154 = vst [vmem:[#allocation8_spill] sm:$0xff] %v2179_v58  ;;  %v220_v60 = vmul.f32 %v2021_v1, %v2179_v58  ;;  %v182_v61 = vsel %vm54_vm8, 0.0, %v22_v44  ;;  %v186_v62 = vsel %vm58_vm9, 0.0, %v26_v47  ;;  %v2201_v3 = vsel %vm91_vm13, 1.0, %v3112_v5 }
  0x12   :  { %3153 = vst [vmem:[#allocation7_spill] sm:$0xff] %v2170_v55  ;;  %v2196_v0 = vsub.f32 %v182_v61, %v216_v59  ;;  %vm60_vm14 = vcmp.ne.f32.partialorder %v28_v63, %v28_v63  ;;  %v221_v4 = vmul.f32 %v2021_v1, %v2201_v3  ;;  %v187_v8 = vsel %vm59_vm12, 0.0, %v27_v56  ;;  %v34_v59 = vld [vmem:[%s3107_s0 + $0x98] sm:$0xff] }
  0x13   :  { %1822 = vmatmul.msk.f32.gmra.mxu0 %vm275_vm5, %v2054_v14  ;;  %v2198_v2 = vsub.f32 %v186_v62, %v220_v60  ;;  %3157 = vst [vmem:[#allocation11_spill] sm:$0xff] %v2201_v3  ;;  %vm92_vm15 = vmxor %vm60_vm14, %vm1993_vm2  ;;  %vm63_vm0 = vcmp.ne.f32.partialorder %v31_v7, %v31_v7  ;;  %vm61_vm3 = vcmp.ne.f32.partialorder %v29_v15, %v29_v15  ;;  %v188_v23 = vsel %vm60_vm14, 0.0, %v28_v63 }
  0x14   :  { %3155 = vst [vmem:[#allocation9_spill] sm:$0xff] %v2196_v0  ;;  %vm95_vm1 = vmxor %vm63_vm0, %vm1993_vm2  ;;  %v191_v12 = vsel %vm63_vm0, 0.0, %v31_v7  ;;  %v2219_v13 = vsub.f32 %v187_v8, %v221_v4  ;;  %v2227_v18 = vsel %vm92_vm15, 1.0, %v3112_v5  ;;  %vm62_vm6 = vcmp.ne.f32.partialorder %v30_v27, %v30_v27  ;;  %v35_v4 = vld [vmem:[%s3107_s0 + $0xa0] sm:$0xff] }
  0x15   :  { %3156 = vst [vmem:[#allocation10_spill] sm:$0xff] %v2198_v2  ;;  %v2217_v9 = vsel %vm95_vm1, 1.0, %v3112_v5  ;;  %v222_v22 = vmul.f32 %v2021_v1, %v2227_v18  ;;  %vm93_vm4 = vmxor %vm61_vm3, %vm1993_vm2  ;;  %v189_v30 = vsel %vm61_vm3, 0.0, %v29_v15  ;;  %v190_v36 = vsel %vm62_vm6, 0.0, %v30_v27 }
  0x16   :  { %3158 = vst [vmem:[#allocation12_spill] sm:$0xff] %v2217_v9  ;;  %v225_v17 = vmul.f32 %v2021_v1, %v2217_v9  ;;  %v2245_v28 = vsel %vm93_vm4, 1.0, %v3112_v5  ;;  %vm94_vm7 = vmxor %vm62_vm6, %vm1993_vm2  ;;  %vm64_vm8 = vcmp.ne.f32.partialorder %v32_v41, %v32_v41  ;;  %vm65_vm10 = vcmp.ne.f32.partialorder %v33_v50, %v33_v50 }
  0x17   :  { %1830 = vmatmul.msk.f32.gmra.mxu1 %vm275_vm5, %v2143_v46  ;;  %3159 = vst [vmem:[#allocation13_spill] sm:$0xff] %v2219_v13  ;;  %v2239_v24 = vsub.f32 %v188_v23, %v222_v22  ;;  %v223_v29 = vmul.f32 %v2021_v1, %v2245_v28  ;;  %v2255_v33 = vsel %vm94_vm7, 1.0, %v3112_v5  ;;  %vm96_vm9 = vmxor %vm64_vm8, %vm1993_vm2  ;;  %v192_v44 = vsel %vm64_vm8, 0.0, %v32_v41  ;;  %v37_v41 = vld [vmem:[%s3107_s0 + $0xb0] sm:$0xff] }
  0x18   :  { %v2229_v20 = vsub.f32 %v191_v12, %v225_v17  ;;  %v224_v35 = vmul.f32 %v2021_v1, %v2255_v33  ;;  %v2270_v42 = vsel %vm96_vm9, 1.0, %v3112_v5  ;;  %vm97_vm11 = vmxor %vm65_vm10, %vm1993_vm2  ;;  %v193_v53 = vsel %vm65_vm10, 0.0, %v33_v50  ;;  %v36_v17 = vld [vmem:[%s3107_s0 + $0xa8] sm:$0xff] }
  0x19   :  { %v2252_v31 = vsub.f32 %v189_v30, %v223_v29  ;;  %v226_v43 = vmul.f32 %v2021_v1, %v2270_v42  ;;  %v2283_v51 = vsel %vm97_vm11, 1.0, %v3112_v5  ;;  %vm66_vm12 = vcmp.ne.f32.partialorder %v34_v59, %v34_v59 }
  0x1a   :  { %1837 = vmatmul.msk.f32.vlgmr.msra.gmra.mxu2 %vm275_vm5, %v2229_v20  ;;  %v2261_v40 = vsub.f32 %v190_v36, %v224_v35  ;;  %v227_v52 = vmul.f32 %v2021_v1, %v2283_v51  ;;  %vm98_vm13 = vmxor %vm66_vm12, %vm1993_vm2  ;;  %v194_v62 = vsel %vm66_vm12, 0.0, %v34_v59  ;;  %vm67_vm14 = vcmp.ne.f32.partialorder %v35_v4, %v35_v4 }
  0x1b   :  { %1823 = vmatmul.msk.f32.gmra.mxu0 %vm275_vm5, %v2067_v19  ;;  %3160 = vst [vmem:[#allocation14_spill] sm:$0xff] %v2252_v31  ;;  %v2274_v47 = vsub.f32 %v192_v44, %v226_v43  ;;  %v2296_v60 = vsel %vm98_vm13, 1.0, %v3112_v5  ;;  %vm99_vm15 = vmxor %vm67_vm14, %vm1993_vm2  ;;  %v195_v12 = vsel %vm67_vm14, 0.0, %v35_v4  ;;  %vm68_vm0 = vcmp.ne.f32.partialorder %v36_v17, %v36_v17 }
  0x1c   :  { %v2287_v56 = vsub.f32 %v193_v53, %v227_v52  ;;  %v228_v61 = vmul.f32 %v2021_v1, %v2296_v60  ;;  %v2309_v7 = vsel %vm99_vm15, 1.0, %v3112_v5  ;;  %vm100_vm1 = vmxor %vm68_vm0, %vm1993_vm2  ;;  %v196_v30 = vsel %vm68_vm0, 0.0, %v36_v17 }
  0x1d   :  { %v229_v8 = vmul.f32 %v2021_v1, %v2309_v7  ;;  %v2322_v23 = vsel %vm100_vm1, 1.0, %v3112_v5  ;;  %vm69_vm3 = vcmp.ne.f32.partialorder %v37_v41, %v37_v41 }
  0x1e   :  { %v2300_v63 = vsub.f32 %v194_v62, %v228_v61  ;;  %v230_v29 = vmul.f32 %v2021_v1, %v2322_v23  ;;  %vm101_vm4 = vmxor %vm69_vm3, %vm1993_vm2  ;;  %v197_v53 = vsel %vm69_vm3, 0.0, %v37_v41  ;;  %v38_v62 = vld [vmem:[%s3107_s0 + $0xb8] sm:$0xff] }
  0x1f   :  { %1831 = vmatmul.msk.f32.gmra.mxu1 %vm275_vm5, %v2170_v55  ;;  %v2313_v15 = vsub.f32 %v195_v12, %v229_v8  ;;  %v2338_v44 = vsel %vm101_vm4, 1.0, %v3112_v5  ;;  %vm70_vm6 = vcmp.ne.f32.partialorder %v38_v62, %v38_v62 }
  0x20   :  { %v2328_v36 = vsub.f32 %v196_v30, %v230_v29  ;;  %v231_v52 = vmul.f32 %v2021_v1, %v2338_v44  ;;  %vm102_vm7 = vmxor %vm70_vm6, %vm1993_vm2  ;;  %v39_v30 = vld [vmem:[%s3107_s0 + $0xc0] sm:$0xff] }
  0x21   :  { %v2354_v8 = vsel %vm102_vm7, 1.0, %v3112_v5  ;;  %vm71_vm8 = vcmp.ne.f32.partialorder %v39_v30, %v39_v30 }
  0x22   :  { %1838 = vmatmul.msk.f32.gmra.mxu2 %vm275_vm5, %v2274_v47  ;;  %v2344_v61 = vsub.f32 %v197_v53, %v231_v52  ;;  %v232_v17 = vmul.f32 %v2021_v1, %v2354_v8  ;;  %vm103_vm9 = vmxor %vm71_vm8, %vm1993_vm2  ;;  %v199_v52 = vsel %vm71_vm8, 0.0, %v39_v30 }
  0x23   :  { %1824 = vmatmul.msk.f32.gmra.mxu0 %vm275_vm5, %v2083_v25  ;;  %v2370_v41 = vsel %vm103_vm9, 1.0, %v3112_v5 }
  0x27   :  { %1832 = vmatmul.msk.f32.gmra.mxu1 %vm275_vm5, %v2198_v2 }
  0x2a   :  { %1839 = vmatmul.msk.f32.gmra.mxu2 %vm275_vm5, %v2287_v56 }
  0x2b   :  { %1825 = vmatmul.msk.f32.gmra.mxu0 %vm275_vm5, %v2109_v34 }
  0x2f   :  { %1833 = vmatmul.msk.f32.gmra.mxu1 %vm275_vm5, %v2219_v13 }
  0x32   :  { %1840 = vmatmul.msk.f32.gmra.mxu2 %vm275_vm5, %v2300_v63 }
  0x33   :  { %1826 = vmatmul.msk.f32.gmra.mxu0 %vm275_vm5, %v2141_v45 }
  0x37   :  { %1834 = vmatmul.msk.f32.gmra.mxu1 %vm275_vm5, %v2239_v24 }
  0x3a   :  { %1841 = vmatmul.msk.f32.gmra.mxu2 %vm275_vm5, %v2313_v15 }
  0x3b   :  { %1827 = vmatmul.msk.f32.gmra.mxu0 %vm275_vm5, %v2168_v54 }
  0x3f   :  { %1835 = vmatmul.msk.f32.gmra.mxu1 %vm275_vm5, %v2252_v31 }
  0x42   :  { %1842 = vmatmul.msk.f32.gmra.mxu2 %vm275_vm5, %v2328_v36 }
  0x43   :  { %1828 = vmatmul.msk.f32.gmra.mxu0 %vm275_vm5, %v2196_v0 }
  0x47   :  { %1836 = vmatmul.msk.f32.gmra.mxu1 %vm275_vm5, %v2261_v40 }
  0x4a   :  { %1843 = vmatmul.msk.f32.gmra.mxu2 %vm275_vm5, %v2344_v61 }
  0x88   :  { %v389_v22 = vpop.f32.mrf.mxu0 }
  0x89   :  { %v485_v27 = vmul.f32 %v2034_v6, %v389_v22  ;;  %v198_v22 = vsel %vm70_vm6, 0.0, %v38_v62  ;;  %v40_v62 = vld [vmem:[%s3107_s0 + $0xc8] sm:$0xff] }
  0x8a   :  { %v2360_v29 = vsub.f32 %v198_v22, %v232_v17  ;;  %vm72_vm10 = vcmp.ne.f32.partialorder %v40_v62, %v40_v62 }
  0x8b   :  { %v517_v35 = vadd.f32 %v485_v27, %v2046_v11  ;;  %vm104_vm11 = vmxor %vm72_vm10, %vm1993_vm2  ;;  %v200_v17 = vsel %vm72_vm10, 0.0, %v40_v62 }
  0x8c   :  { %1844 = vmatmul.msk.f32.gmra.mxu2 %vm275_vm5, %v2360_v29 }
  0x8d   :  { %1853 = vmatmul.msk.f32.vlgmr.msrb.gmra.mxu1 %vm275_vm5, %v517_v35 }
  0x90   :  { %v392_v43 = vpop.f32.mrf.mxu0 }
  0x91   :  { %v486_v50 = vmul.f32 %v2044_v10, %v392_v43 }
  0x93   :  { %v518_v59 = vadd.f32 %v486_v50, %v2054_v14  ;;  %v233_v50 = vmul.f32 %v2021_v1, %v2370_v41 }
  0x95   :  { %1854 = vmatmul.msk.f32.gmra.mxu1 %vm275_vm5, %v518_v59  ;;  %v2376_v59 = vsub.f32 %v199_v52, %v233_v50 }
  0x97   :  { %1845 = vmatmul.msk.f32.vlgmr.msra.gmra.mxu3 %vm275_vm5, %v2376_v59 }
  0x98   :  { %v395_v4 = vpop.f32.mrf.mxu0 }
  0x99   :  { %v487_v12 = vmul.f32 %v2060_v16, %v395_v4 }
  0x9b   :  { %v519_v27 = vadd.f32 %v487_v12, %v2067_v19  ;;  %v2386_v12 = vsel %vm104_vm11, 1.0, %v3112_v5 }
  0x9d   :  { %1855 = vmatmul.msk.f32.gmra.mxu1 %vm275_vm5, %v519_v27  ;;  %v234_v27 = vmul.f32 %v2021_v1, %v2386_v12 }
  0xa0   :  { %v398_v35 = vpop.f32.mrf.mxu0 }
  0xa1   :  { %v488_v43 = vmul.f32 %v2073_v21, %v398_v35  ;;  %v2392_v35 = vsub.f32 %v200_v17, %v234_v27  ;;  %v413_v27 = vpop.f32.mrf.mxu1 }
  0xa3   :  { %v520_v53 = vadd.f32 %v488_v43, %v2083_v25  ;;  %3161 = vst [vmem:[#allocation15_spill] sm:$0xff] %v2392_v35  ;;  %1846 = vmatmul.msk.f32.gmra.mxu3 %vm275_vm5, %v2392_v35  ;;  %v41_v43 = vld [vmem:[%s3107_s0 + $0xd0] sm:$0xff]  ;;  %v493_v35 = vmul.f32 %v2105_v32, %v413_v27 }
  0xa4   :  { %vm73_vm12 = vcmp.ne.f32.partialorder %v41_v43, %v41_v43 }
  0xa5   :  { %1856 = vmatmul.msk.f32.gmra.mxu1 %vm275_vm5, %v520_v53  ;;  %vm105_vm13 = vmxor %vm73_vm12, %vm1993_vm2  ;;  %v201_v53 = vsel %vm73_vm12, 0.0, %v41_v43 }
  0xa6   :  { %v2402_v52 = vsel %vm105_vm13, 1.0, %v3112_v5 }
  0xa7   :  { %3162 = vst [vmem:[#allocation16_spill] sm:$0xff] %v2402_v52 }
  0xa8   :  { %v401_v4 = vpop.f32.mrf.mxu0 }
  0xa9   :  { %v489_v22 = vmul.f32 %v2086_v26, %v401_v4  ;;  %v235_v4 = vmul.f32 %v2021_v1, %v2402_v52  ;;  %v416_v52 = vpop.f32.mrf.mxu1 }
  0xab   :  { %v521_v30 = vadd.f32 %v489_v22, %v2109_v34  ;;  %v2408_v22 = vsub.f32 %v201_v53, %v235_v4 }
  0xad   :  { %1857 = vmatmul.msk.f32.gmra.mxu1 %vm275_vm5, %v521_v30  ;;  %3163 = vst [vmem:[#allocation17_spill] sm:$0xff] %v2408_v22  ;;  %1847 = vmatmul.msk.f32.gmra.mxu3 %vm275_vm5, %v2408_v22  ;;  %v42_v30 = vld [vmem:[%s3107_s0 + $0xd8] sm:$0xff] }
  0xae   :  { %vm74_vm14 = vcmp.ne.f32.partialorder %v42_v30, %v42_v30 }
  0xaf   :  { %vm106_vm15 = vmxor %vm74_vm14, %vm1993_vm2 }
  0xb0   :  { %v404_v50 = vpop.f32.mrf.mxu0 }
  0xb1   :  { %v490_v62 = vmul.f32 %v2117_v37, %v404_v50  ;;  %v2418_v50 = vsel %vm106_vm15, 1.0, %v3112_v5  ;;  %v43_v5 = vld [vmem:[%s3107_s0 + $0xe0] sm:$0xff] }
  0xb2   :  { %3164 = vst [vmem:[#allocation18_spill] sm:$0xff] %v2418_v50  ;;  %v236_v4 = vmul.f32 %v2021_v1, %v2418_v50  ;;  %vm75_vm0 = vcmp.ne.f32.partialorder %v43_v5, %v43_v5 }
  0xb3   :  { %v522_v17 = vadd.f32 %v490_v62, %v2141_v45  ;;  %v202_v62 = vsel %vm74_vm14, 0.0, %v42_v30  ;;  %vm107_vm1 = vmxor %vm75_vm0, %vm1993_vm2 }
  0xb4   :  { %v2424_v22 = vsub.f32 %v202_v62, %v236_v4 }
  0xb5   :  { %1858 = vmatmul.msk.f32.gmra.mxu1 %vm275_vm5, %v522_v17 }
  0xb6   :  { %3165 = vst [vmem:[#allocation19_spill] sm:$0xff] %v2424_v22  ;;  %1848 = vmatmul.msk.f32.gmra.mxu3 %vm275_vm5, %v2424_v22 }
  0xb8   :  { %v407_v43 = vpop.f32.mrf.mxu0 }
  0xb9   :  { %v491_v53 = vmul.f32 %v2149_v48, %v407_v43  ;;  %v3166_v43 = vmov 0.0  }
  0xba   :  { %v2434_v50 = vsel %vm107_vm1, 1.0, %v3166_v43 }
  0xbb   :  { %v523_v17 = vadd.f32 %v491_v53, %v2168_v54  ;;  %3167 = vst [vmem:[#allocation20_spill] sm:$0xff] %v2434_v50  ;;  %v203_v53 = vsel %vm75_vm0, 0.0, %v43_v5  ;;  %v237_v4 = vmul.f32 %v2021_v1, %v2434_v50  ;;  %v44_v5 = vld [vmem:[%s3107_s0 + $0xe8] sm:$0xff] }
  0xbc   :  { %vm76_vm3 = vcmp.ne.f32.partialorder %v44_v5, %v44_v5 }
  0xbd   :  { %1859 = vmatmul.msk.f32.gmra.mxu1 %vm275_vm5, %v523_v17  ;;  %v2440_v22 = vsub.f32 %v203_v53, %v237_v4  ;;  %vm108_vm4 = vmxor %vm76_vm3, %vm1993_vm2  ;;  %v204_v53 = vsel %vm76_vm3, 0.0, %v44_v5 }
  0xbe   :  { %v2451_v50 = vsel %vm108_vm4, 1.0, %v3166_v43 }
  0xbf   :  { %3168 = vst [vmem:[#allocation21_spill] sm:$0xff] %v2440_v22  ;;  %1849 = vmatmul.msk.f32.gmra.mxu3 %vm275_vm5, %v2440_v22  ;;  %v238_v27 = vmul.f32 %v2021_v1, %v2451_v50  ;;  %v45_v22 = vld [vmem:[%s3107_s0 + $0xf0] sm:$0xff] }
  0xc0   :  { %v410_v30 = vpop.f32.mrf.mxu0  ;;  %3169 = vst [vmem:[#allocation22_spill] sm:$0xff] %v2451_v50  ;;  %vm77_vm6 = vcmp.ne.f32.partialorder %v45_v22, %v45_v22  ;;  %v46_v50 = vld [vmem:[%s3107_s0 + $0xf8] sm:$0xff] }
  0xc1   :  { %v492_v62 = vmul.f32 %v2176_v57, %v410_v30  ;;  %v419_v30 = vpop.f32.mrf.mxu1  ;;  %v2456_v4 = vsub.f32 %v204_v53, %v238_v27  ;;  %vm109_vm7 = vmxor %vm77_vm6, %vm1993_vm2  ;;  %v205_v5 = vsel %vm77_vm6, 0.0, %v45_v22  ;;  %vm78_vm8 = vcmp.ne.f32.partialorder %v46_v50, %v46_v50 }
  0xc2   :  { %vm110_vm9 = vmxor %vm78_vm8, %vm1993_vm2  ;;  %vm1346_vm2 = vcmask 261120  }
  0xc3   :  { %v524_v17 = vadd.f32 %v492_v62, %v2196_v0  ;;  %v525_v62 = vadd.f32 %v493_v35, %v2122_v39  ;;  %3170 = vst [vmem:[#allocation23_spill] sm:$0xff] %v2456_v4  ;;  %v2467_v35 = vsel %vm109_vm7, 1.0, %v3166_v43  ;;  %v2483_v22 = vsel %vm110_vm9, 1.0, %v3166_v43 }
  0xc4   :  { %3171 = vst [vmem:[#allocation24_spill] sm:$0xff] %v2467_v35 }
  0xc5   :  { %1860 = vmatmul.msk.f32.gmra.mxu1 %vm275_vm5, %v524_v17  ;;  %v494_v17 = vmul.f32 %v2120_v38, %v416_v52 }
  0xc7   :  { %1850 = vmatmul.msk.f32.gmra.mxu3 %vm275_vm5, %v2456_v4  ;;  %v526_v53 = vadd.f32 %v494_v17, %v2143_v46  ;;  %v495_v4 = vmul.f32 %v2152_v49, %v419_v30  ;;  %v206_v17 = vsel %vm78_vm8, 0.0, %v46_v50 }
  0xc9   :  { %v422_v52 = vpop.f32.mrf.mxu1 }
  0xcd   :  { %1861 = vmatmul.msk.f32.gmra.mxu1 %vm275_vm5, %v525_v62  ;;  %v239_v62 = vmul.f32 %v2021_v1, %v2467_v35 }
  0xcf   :  { %v2472_v27 = vsub.f32 %v205_v5, %v239_v62  ;;  %v527_v5 = vadd.f32 %v495_v4, %v2170_v55 }
  0xd1   :  { %3172 = vst [vmem:[#allocation25_spill] sm:$0xff] %v2472_v27  ;;  %1851 = vmatmul.msk.f32.gmra.mxu3 %vm275_vm5, %v2472_v27  ;;  %v425_v62 = vpop.f32.mrf.mxu1  ;;  %v496_v27 = vmul.f32 %v2179_v58, %v422_v52  ;;  %v437_v52 = vpop.f32.mrf.mxu2 }
  0xd2   :  { %v497_v50 = vmul.f32 %v2201_v3, %v425_v62 }
  0xd3   :  { %v528_v35 = vadd.f32 %v496_v27, %v2198_v2 }
  0xd4   :  { %v529_v4 = vadd.f32 %v497_v50, %v2219_v13 }
  0xd5   :  { %1862 = vmatmul.msk.f32.gmra.mxu1 %vm275_vm5, %v526_v53  ;;  %v240_v53 = vmul.f32 %v2021_v1, %v2483_v22 }
  0xd7   :  { %v2488_v30 = vsub.f32 %v206_v17, %v240_v53 }
  0xd9   :  { %3173 = vst [vmem:[#allocation26_spill] sm:$0xff] %v2488_v30  ;;  %1852 = vmatmul.msk.f32.gmra.mxu3 %vm275_vm5, %v2488_v30  ;;  %v428_v43 = vpop.f32.mrf.mxu1  ;;  %v440_v50 = vpop.f32.mrf.mxu2 }
  0xda   :  { %v498_v1 = vmul.f32 %v2227_v18, %v428_v43  ;;  %v501_v43 = vmul.f32 %v2217_v9, %v437_v52 }
  0xdc   :  { %v533_v30 = vadd.f32 %v501_v43, %v2229_v20 }
  0xdd   :  { %1863 = vmatmul.msk.f32.gmra.mxu1 %vm275_vm5, %v527_v5  ;;  %v530_v5 = vadd.f32 %v498_v1, %v2239_v24 }
  0xe1   :  { %v431_v17 = vpop.f32.mrf.mxu1  ;;  %v443_v1 = vpop.f32.mrf.mxu2 }
  0xe2   :  { %v499_v53 = vmul.f32 %v2245_v28, %v431_v17  ;;  %v503_v43 = vmul.f32 %v2283_v51, %v443_v1 }
  0xe4   :  { %v531_v27 = vadd.f32 %v499_v53, %v2252_v31 }
  0xe5   :  { %1864 = vmatmul.msk.f32.gmra.mxu1 %vm275_vm5, %v528_v35 }
  0xe9   :  { %v434_v35 = vpop.f32.mrf.mxu1 }
  0xea   :  { %v500_v62 = vmul.f32 %v2255_v33, %v434_v35 }
  0xed   :  { %1865 = vmatmul.msk.f32.gmra.mxu1 %vm275_vm5, %v529_v4  ;;  %v532_v4 = vadd.f32 %v500_v62, %v2261_v40 }
  0xf5   :  { %1866 = vmatmul.msk.f32.gmra.mxu1 %vm275_vm5, %v530_v5 }
  0xfd   :  { %1867 = vmatmul.msk.f32.gmra.mxu1 %vm275_vm5, %v531_v27  ;;  %v502_v27 = vmul.f32 %v2270_v42, %v440_v50 }
  0xff   :  { %v534_v35 = vadd.f32 %v502_v27, %v2274_v47 }
 0x105   :  { %1868 = vmatmul.msk.f32.gmra.mxu1 %vm275_vm5, %v532_v4  ;;  %v446_v4 = vpop.f32.mrf.mxu2 }
 0x106   :  { %v504_v27 = vmul.f32 %v2296_v60, %v446_v4 }
 0x10a   :  { %v662_v5 = vpop.f32.mrf.mxu1 }
 0x10b   :  { %v758_v17 = vmul.f32 %v2034_v6, %v662_v5 }
 0x10d   :  { %v790_v53 = vadd.f32 %v758_v17, %v2046_v11  ;;  %1869 = vmatmul.msk.f32.gmra.mxu1 %vm275_vm5, %v533_v30  ;;  %v535_v30 = vadd.f32 %v503_v43, %v2287_v56  ;;  %v449_v17 = vpop.f32.mrf.mxu2 }
 0x10f   :  { %1885 = vmatmul.msk.f32.vlgmr.msrb.gmra.mxu2 %vm275_vm5, %v790_v53 }
 0x112   :  { %v665_v62 = vpop.f32.mrf.mxu1 }
 0x113   :  { %v759_v52 = vmul.f32 %v2044_v10, %v665_v62 }
 0x115   :  { %v791_v9 = vadd.f32 %v759_v52, %v2054_v14  ;;  %1870 = vmatmul.msk.f32.gmra.mxu1 %vm275_vm5, %v534_v35  ;;  %v536_v35 = vadd.f32 %v504_v27, %v2300_v63  ;;  %v505_v52 = vmul.f32 %v2309_v7, %v449_v17  ;;  %v452_v43 = vpop.f32.mrf.mxu2 }
 0x117   :  { %1886 = vmatmul.msk.f32.gmra.mxu2 %vm275_vm5, %v791_v9 }
 0x11a   :  { %v668_v5 = vpop.f32.mrf.mxu1 }
 0x11b   :  { %v760_v50 = vmul.f32 %v2060_v16, %v668_v5 }
 0x11d   :  { %v792_v53 = vadd.f32 %v760_v50, %v2067_v19  ;;  %1871 = vmatmul.msk.f32.gmra.mxu1 %vm275_vm5, %v535_v30  ;;  %v537_v30 = vadd.f32 %v505_v52, %v2313_v15  ;;  %v455_v27 = vpop.f32.mrf.mxu2 }
 0x11e   :  { %v507_v52 = vmul.f32 %v2338_v44, %v455_v27 }
 0x11f   :  { %1887 = vmatmul.msk.f32.gmra.mxu2 %vm275_vm5, %v792_v53  ;;  %v506_v53 = vmul.f32 %v2322_v23, %v452_v43  ;;  %v1096_v43 = vld [vmem:[%s3106_s1 + $0x18] sm:$0xff] }
 0x120   :  { %1209 = vmatpush.msrb.mxu3 %v1096_v43 }
 0x122   :  { %v671_v62 = vpop.f32.mrf.mxu1 }
 0x123   :  { %v761_v1 = vmul.f32 %v2073_v21, %v671_v62 }
 0x125   :  { %v793_v9 = vadd.f32 %v761_v1, %v2083_v25  ;;  %1872 = vmatmul.msk.f32.gmra.mxu1 %vm275_vm5, %v536_v35  ;;  %v538_v35 = vadd.f32 %v506_v53, %v2328_v36  ;;  %v461_v1 = vpop.f32.mrf.mxu3 }
 0x126   :  { %v509_v43 = vmul.f32 %v2370_v41, %v461_v1 }
 0x127   :  { %1888 = vmatmul.msk.f32.gmra.mxu2 %vm275_vm5, %v793_v9 }
 0x12a   :  { %v674_v5 = vpop.f32.mrf.mxu1 }
 0x12b   :  { %v762_v4 = vmul.f32 %v2086_v26, %v674_v5 }
 0x12d   :  { %v794_v50 = vadd.f32 %v762_v4, %v2109_v34  ;;  %1873 = vmatmul.msk.f32.gmra.mxu1 %vm275_vm5, %v537_v30  ;;  %v539_v30 = vadd.f32 %v507_v52, %v2344_v61  ;;  %v458_v4 = vpop.f32.mrf.mxu2  ;;  %v464_v27 = vpop.f32.mrf.mxu3 }
 0x12f   :  { %1889 = vmatmul.msk.f32.gmra.mxu2 %vm275_vm5, %v794_v50 }
 0x132   :  { %v677_v17 = vpop.f32.mrf.mxu1 }
 0x133   :  { %v763_v62 = vmul.f32 %v2117_v37, %v677_v17 }
 0x135   :  { %v795_v9 = vadd.f32 %v763_v62, %v2141_v45  ;;  %1874 = vmatmul.msk.f32.gmra.mxu1 %vm275_vm5, %v538_v35  ;;  %v508_v35 = vmul.f32 %v2354_v8, %v458_v4 }
 0x137   :  { %1890 = vmatmul.msk.f32.gmra.mxu2 %vm275_vm5, %v795_v9  ;;  %v540_v17 = vadd.f32 %v508_v35, %v2360_v29  ;;  %v510_v35 = vmul.f32 %v2386_v12, %v464_v27  ;;  %v1095_v27 = vld [vmem:[%s3106_s1 + $0x10] sm:$0xff] }
 0x138   :  { %1210 = vmatpush.msrb.mxu3 %v1095_v27 }
 0x13a   :  { %v680_v5 = vpop.f32.mrf.mxu1 }
 0x13b   :  { %v764_v50 = vmul.f32 %v2149_v48, %v680_v5  ;;  %v467_v5 = vpop.f32.mrf.mxu3 }
 0x13d   :  { %v796_v53 = vadd.f32 %v764_v50, %v2168_v54  ;;  %1875 = vmatmul.msk.f32.gmra.mxu1 %vm275_vm5, %v539_v30  ;;  %v541_v30 = vadd.f32 %v509_v43, %v2376_v59  ;;  %v3175_v43 = vld [vmem:[#allocation16_spill] sm:$0xff] }
 0x13f   :  { %1891 = vmatmul.msk.f32.gmra.mxu2 %vm275_vm5, %v796_v53 }
 0x142   :  { %v683_v62 = vpop.f32.mrf.mxu1 }
 0x143   :  { %v765_v9 = vmul.f32 %v2176_v57, %v683_v62  ;;  %v3174_v62 = vld [vmem:[#allocation15_spill] sm:$0xff]  ;;  %v470_v1 = vpop.f32.mrf.mxu3 }
 0x145   :  { %v797_v52 = vadd.f32 %v765_v9, %v2196_v0  ;;  %1876 = vmatmul.msk.f32.gmra.mxu1 %vm275_vm5, %v540_v17  ;;  %v542_v17 = vadd.f32 %v510_v35, %v3174_v62 }
 0x147   :  { %1892 = vmatmul.msk.f32.gmra.mxu2 %vm275_vm5, %v797_v52 }
 0x14a   :  { %v686_v4 = vpop.f32.mrf.mxu1 }
 0x14b   :  { %v766_v50 = vmul.f32 %v2105_v32, %v686_v4  ;;  %v511_v4 = vmul.f32 %v3175_v43, %v467_v5 }
 0x14d   :  { %v798_v53 = vadd.f32 %v766_v50, %v2122_v39  ;;  %1877 = vmatmul.msk.f32.gmra.mxu1 %vm275_vm5, %v541_v30  ;;  %v3176_v30 = vld [vmem:[#allocation17_spill] sm:$0xff]  ;;  %v473_v39 = vpop.f32.mrf.mxu3 }
 0x14e   :  { %v543_v50 = vadd.f32 %v511_v4, %v3176_v30  ;;  %v3179_v4 = vld [vmem:[#allocation20_spill] sm:$0xff] }
 0x14f   :  { %1893 = vmatmul.msk.f32.gmra.mxu2 %vm275_vm5, %v798_v53 }
 0x152   :  { %v689_v9 = vpop.f32.mrf.mxu1 }
 0x153   :  { %v767_v52 = vmul.f32 %v2120_v38, %v689_v9 }
 0x155   :  { %v799_v0 = vadd.f32 %v767_v52, %v2143_v46  ;;  %1878 = vmatmul.msk.f32.gmra.mxu1 %vm275_vm5, %v542_v17  ;;  %v3177_v17 = vld [vmem:[#allocation18_spill] sm:$0xff] }
 0x156   :  { %v512_v52 = vmul.f32 %v3177_v17, %v470_v1 }
 0x157   :  { %1894 = vmatmul.msk.f32.gmra.mxu2 %vm275_vm5, %v799_v0  ;;  %v3178_v0 = vld [vmem:[#allocation19_spill] sm:$0xff] }
 0x158   :  { %v544_v5 = vadd.f32 %v512_v52, %v3178_v0  ;;  %v3181_v52 = vld [vmem:[#allocation22_spill] sm:$0xff] }
 0x15a   :  { %v692_v53 = vpop.f32.mrf.mxu1 }
 0x15b   :  { %v768_v35 = vmul.f32 %v2152_v49, %v692_v53  ;;  %v513_v53 = vmul.f32 %v3179_v4, %v473_v39  ;;  %v476_v49 = vpop.f32.mrf.mxu3 }
 0x15d   :  { %v800_v9 = vadd.f32 %v768_v35, %v2170_v55  ;;  %1879 = vmatmul.msk.f32.gmra.mxu1 %vm275_vm5, %v543_v50  ;;  %v3180_v35 = vld [vmem:[#allocation21_spill] sm:$0xff] }
 0x15e   :  { %v545_v50 = vadd.f32 %v513_v53, %v3180_v35  ;;  %v3183_v53 = vld [vmem:[#allocation24_spill] sm:$0xff] }
 0x15f   :  { %1895 = vmatmul.msk.f32.gmra.mxu2 %vm275_vm5, %v800_v9 }
 0x162   :  { %v695_v46 = vpop.f32.mrf.mxu1 }
 0x163   :  { %v769_v38 = vmul.f32 %v2179_v58, %v695_v46  ;;  %v514_v46 = vmul.f32 %v3181_v52, %v476_v49 }
 0x165   :  { %v801_v27 = vadd.f32 %v769_v38, %v2198_v2  ;;  %1880 = vmatmul.msk.f32.gmra.mxu1 %vm275_vm5, %v544_v5  ;;  %v479_v38 = vpop.f32.mrf.mxu3  ;;  %v3182_v5 = vld [vmem:[#allocation23_spill] sm:$0xff] }
 0x166   :  { %v546_v2 = vadd.f32 %v514_v46, %v3182_v5 }
 0x167   :  { %1896 = vmatmul.msk.f32.gmra.mxu2 %vm275_vm5, %v801_v27 }
 0x16a   :  { %v698_v55 = vpop.f32.mrf.mxu1 }
 0x16b   :  { %v770_v1 = vmul.f32 %v2201_v3, %v698_v55  ;;  %v515_v55 = vmul.f32 %v3183_v53, %v479_v38 }
 0x16d   :  { %v802_v9 = vadd.f32 %v770_v1, %v2219_v13  ;;  %1881 = vmatmul.msk.f32.gmra.mxu1 %vm275_vm5, %v545_v50  ;;  %v3184_v1 = vld [vmem:[#allocation25_spill] sm:$0xff]  ;;  %v482_v49 = vpop.f32.mrf.mxu3 }
 0x16e   :  { %v547_v50 = vadd.f32 %v515_v55, %v3184_v1  ;;  %v516_v46 = vmul.f32 %v2483_v22, %v482_v49  ;;  %v3186_v55 = vld [vmem:[#allocation12_spill] sm:$0xff] }
 0x16f   :  { %1897 = vmatmul.msk.f32.gmra.mxu2 %vm275_vm5, %v802_v9 }
 0x172   :  { %v701_v39 = vpop.f32.mrf.mxu1 }
 0x173   :  { %v771_v58 = vmul.f32 %v2227_v18, %v701_v39 }
 0x175   :  { %v803_v27 = vadd.f32 %v771_v58, %v2239_v24  ;;  %1882 = vmatmul.msk.f32.gmra.mxu1 %vm275_vm5, %v546_v2  ;;  %v3185_v58 = vld [vmem:[#allocation26_spill] sm:$0xff] }
 0x176   :  { %v548_v2 = vadd.f32 %v516_v46, %v3185_v58 }
 0x177   :  { %1898 = vmatmul.msk.f32.gmra.mxu2 %vm275_vm5, %v803_v27 }
 0x17a   :  { %v704_v13 = vpop.f32.mrf.mxu1 }
 0x17b   :  { %v772_v9 = vmul.f32 %v2245_v28, %v704_v13 }
 0x17d   :  { %v804_v3 = vadd.f32 %v772_v9, %v2252_v31  ;;  %1883 = vmatmul.msk.f32.gmra.mxu1 %vm275_vm5, %v547_v50 }
 0x17f   :  { %1899 = vmatmul.msk.f32.gmra.mxu2 %vm275_vm5, %v804_v3 }
 0x182   :  { %v707_v39 = vpop.f32.mrf.mxu1 }
 0x183   :  { %v773_v38 = vmul.f32 %v2255_v33, %v707_v39 }
 0x185   :  { %v805_v27 = vadd.f32 %v773_v38, %v2261_v40  ;;  %1884 = vmatmul.msk.f32.gmra.mxu1 %vm275_vm5, %v548_v2 }
 0x187   :  { %1900 = vmatmul.msk.f32.gmra.mxu2 %vm275_vm5, %v805_v27 }
 0x18a   :  { %v710_v13 = vpop.f32.mrf.mxu1 }
 0x18b   :  { %v774_v9 = vmul.f32 %v3186_v55, %v710_v13 }
 0x18d   :  { %v806_v50 = vadd.f32 %v774_v9, %v2229_v20 }
 0x18f   :  { %1901 = vmatmul.msk.f32.gmra.mxu2 %vm275_vm5, %v806_v50 }
 0x192   :  { %v713_v49 = vpop.f32.mrf.mxu1  ;;  %v935_v3 = vpop.f32.mrf.mxu2 }
 0x193   :  { %v775_v46 = vmul.f32 %v2270_v42, %v713_v49  ;;  %v1031_v31 = vmul.f32 %v2034_v6, %v935_v3 }
 0x195   :  { %v807_v39 = vadd.f32 %v775_v46, %v2274_v47  ;;  %v1063_v38 = vadd.f32 %v1031_v31, %v2046_v11 }
 0x197   :  { %1902 = vmatmul.msk.f32.gmra.mxu2 %vm275_vm5, %v807_v39  ;;  %1917 = vmatmul.msk.f32.vlgmr.msrb.gmra.mxu3 %vm275_vm5, %v1063_v38 }
 0x19a   :  { %v716_v2 = vpop.f32.mrf.mxu1  ;;  %v938_v27 = vpop.f32.mrf.mxu2 }
 0x19b   :  { %v776_v13 = vmul.f32 %v2283_v51, %v716_v2  ;;  %v1032_v9 = vmul.f32 %v2044_v10, %v938_v27 }
 0x19d   :  { %v808_v50 = vadd.f32 %v776_v13, %v2287_v56  ;;  %v1064_v49 = vadd.f32 %v1032_v9, %v2054_v14 }
 0x19f   :  { %1903 = vmatmul.msk.f32.gmra.mxu2 %vm275_vm5, %v808_v50  ;;  %1918 = vmatmul.msk.f32.gmra.mxu3 %vm275_vm5, %v1064_v49 }
 0x1a2   :  { %v719_v6 = vpop.f32.mrf.mxu1  ;;  %v941_v11 = vpop.f32.mrf.mxu2 }
 0x1a3   :  { %v777_v31 = vmul.f32 %v2296_v60, %v719_v6  ;;  %v1033_v3 = vmul.f32 %v2060_v16, %v941_v11 }
 0x1a5   :  { %v809_v46 = vadd.f32 %v777_v31, %v2300_v63  ;;  %v1065_v39 = vadd.f32 %v1033_v3, %v2067_v19 }
 0x1a7   :  { %1904 = vmatmul.msk.f32.gmra.mxu2 %vm275_vm5, %v809_v46  ;;  %1919 = vmatmul.msk.f32.gmra.mxu3 %vm275_vm5, %v1065_v39 }
 0x1aa   :  { %v722_v10 = vpop.f32.mrf.mxu1  ;;  %v944_v14 = vpop.f32.mrf.mxu2 }
 0x1ab   :  { %v778_v38 = vmul.f32 %v2309_v7, %v722_v10  ;;  %v1034_v2 = vmul.f32 %v2073_v21, %v944_v14 }
 0x1ad   :  { %v810_v27 = vadd.f32 %v778_v38, %v2313_v15  ;;  %v1066_v13 = vadd.f32 %v1034_v2, %v2083_v25 }
 0x1af   :  { %1905 = vmatmul.msk.f32.gmra.mxu2 %vm275_vm5, %v810_v27  ;;  %1920 = vmatmul.msk.f32.gmra.mxu3 %vm275_vm5, %v1066_v13 }
 0x1b2   :  { %v725_v16 = vpop.f32.mrf.mxu1  ;;  %v947_v19 = vpop.f32.mrf.mxu2 }
 0x1b3   :  { %v779_v9 = vmul.f32 %v2322_v23, %v725_v16  ;;  %v1035_v50 = vmul.f32 %v2086_v26, %v947_v19  ;;  %v1343_v26 = vld [vmem:[%s3106_s1 + $0x38] sm:$0xff]  ;;  %v3187_v19 = vld [vmem:[#allocation9_spill] sm:$0xff] }
 0x1b4   :  { %1455 = vmatpush.msrb.mxu0 %v1343_v26 }
 0x1b5   :  { %v811_v49 = vadd.f32 %v779_v9, %v2328_v36  ;;  %v1067_v6 = vadd.f32 %v1035_v50, %v2109_v34 }
 0x1b7   :  { %1906 = vmatmul.msk.f32.gmra.mxu2 %vm275_vm5, %v811_v49  ;;  %1921 = vmatmul.msk.f32.gmra.mxu3 %vm275_vm5, %v1067_v6 }
 0x1ba   :  { %v728_v21 = vpop.f32.mrf.mxu1  ;;  %v950_v25 = vpop.f32.mrf.mxu2 }
 0x1bb   :  { %v780_v11 = vmul.f32 %v2338_v44, %v728_v21  ;;  %v1036_v31 = vmul.f32 %v2117_v37, %v950_v25  ;;  %v3188_v21 = vld [vmem:[#allocation4_spill] sm:$0xff] }
 0x1bd   :  { %v812_v3 = vadd.f32 %v780_v11, %v2344_v61  ;;  %v1068_v46 = vadd.f32 %v1036_v31, %v2141_v45 }
 0x1bf   :  { %1907 = vmatmul.msk.f32.gmra.mxu2 %vm275_vm5, %v812_v3  ;;  %1922 = vmatmul.msk.f32.gmra.mxu3 %vm275_vm5, %v1068_v46  ;;  %v3189_v46 = vld [vmem:[#allocation3_spill] sm:$0xff] }
 0x1c2   :  { %v731_v34 = vpop.f32.mrf.mxu1  ;;  %v953_v39 = vpop.f32.mrf.mxu2 }
 0x1c3   :  { %v781_v10 = vmul.f32 %v2354_v8, %v731_v34  ;;  %v1037_v14 = vmul.f32 %v2149_v48, %v953_v39  ;;  %v1342_v48 = vld [vmem:[%s3106_s1 + $0x30] sm:$0xff] }
 0x1c4   :  { %1456 = vmatpush.msrb.mxu0 %v1342_v48  ;;  %v3190_v39 = vld [vmem:[#allocation5_spill] sm:$0xff] }
 0x1c5   :  { %v813_v37 = vadd.f32 %v781_v10, %v2360_v29  ;;  %v1069_v38 = vadd.f32 %v1037_v14, %v2168_v54 }
 0x1c7   :  { %1908 = vmatmul.msk.f32.gmra.mxu2 %vm275_vm5, %v813_v37  ;;  %1923 = vmatmul.msk.f32.gmra.mxu3 %vm275_vm5, %v1069_v38 }
 0x1ca   :  { %v734_v45 = vpop.f32.mrf.mxu1  ;;  %v956_v2 = vpop.f32.mrf.mxu2 }
 0x1cb   :  { %v782_v27 = vmul.f32 %v2370_v41, %v734_v45  ;;  %v1038_v13 = vmul.f32 %v2176_v57, %v956_v2  ;;  %v3191_v45 = vld [vmem:[#allocation6_spill] sm:$0xff] }
 0x1cd   :  { %v814_v16 = vadd.f32 %v782_v27, %v2376_v59  ;;  %v1070_v9 = vadd.f32 %v1038_v13, %v3187_v19  ;;  %v3192_v13 = vld [vmem:[#allocation7_spill] sm:$0xff] }
 0x1cf   :  { %1909 = vmatmul.msk.f32.gmra.mxu2 %vm275_vm5, %v814_v16  ;;  %1924 = vmatmul.msk.f32.gmra.mxu3 %vm275_vm5, %v1070_v9 }
 0x1d2   :  { %v737_v54 = vpop.f32.mrf.mxu1  ;;  %v959_v50 = vpop.f32.mrf.mxu2 }
 0x1d3   :  { %v783_v49 = vmul.f32 %v2386_v12, %v737_v54  ;;  %v1039_v6 = vmul.f32 %v2105_v32, %v959_v50  ;;  %v1341_v32 = vld [vmem:[%s3106_s1 + $0x28] sm:$0xff] }
 0x1d4   :  { %1457 = vmatpush.msrb.mxu0 %v1341_v32  ;;  %v3193_v54 = vld [vmem:[#allocation8_spill] sm:$0xff] }
 0x1d5   :  { %v815_v57 = vadd.f32 %v783_v49, %v3174_v62  ;;  %v1071_v25 = vadd.f32 %v1039_v6, %v3188_v21  ;;  %v3194_v6 = vld [vmem:[#allocation10_spill] sm:$0xff]  ;;  %v1340_v21 = vld [vmem:[%s3106_s1 + $0x20] sm:$0xff] }
 0x1d6   :  { %1458 = vmatpush.msrb.mxu0 %v1340_v21 }
 0x1d7   :  { %1910 = vmatmul.msk.f32.gmra.mxu2 %vm275_vm5, %v815_v57  ;;  %1925 = vmatmul.msk.f32.gmra.mxu3 %vm275_vm5, %v1071_v25 }
 0x1da   :  { %v740_v11 = vpop.f32.mrf.mxu1  ;;  %v962_v31 = vpop.f32.mrf.mxu2 }
 0x1db   :  { %v784_v3 = vmul.f32 %v3175_v43, %v740_v11  ;;  %v1040_v26 = vmul.f32 %v3189_v46, %v962_v31 }
 0x1dd   :  { %v816_v34 = vadd.f32 %v784_v3, %v3176_v30  ;;  %v1072_v10 = vadd.f32 %v1040_v26, %v3190_v39  ;;  %v3195_v3 = vld [vmem:[#allocation11_spill] sm:$0xff] }
 0x1df   :  { %1911 = vmatmul.msk.f32.gmra.mxu2 %vm275_vm5, %v816_v34  ;;  %1926 = vmatmul.msk.f32.gmra.mxu3 %vm275_vm5, %v1072_v10  ;;  %v3196_v34 = vld [vmem:[#allocation13_spill] sm:$0xff] }
 0x1e2   :  { %v743_v14 = vpop.f32.mrf.mxu1  ;;  %v965_v37 = vpop.f32.mrf.mxu2 }
 0x1e3   :  { %v785_v38 = vmul.f32 %v3177_v17, %v743_v14  ;;  %v1041_v2 = vmul.f32 %v3191_v45, %v965_v37 }
 0x1e5   :  { %v817_v27 = vadd.f32 %v785_v38, %v3178_v0  ;;  %v1073_v16 = vadd.f32 %v1041_v2, %v3192_v13 }
 0x1e7   :  { %1912 = vmatmul.msk.f32.gmra.mxu2 %vm275_vm5, %v817_v27  ;;  %1927 = vmatmul.msk.f32.gmra.mxu3 %vm275_vm5, %v1073_v16 }
 0x1ea   :  { %v746_v19 = vpop.f32.mrf.mxu1  ;;  %v968_v9 = vpop.f32.mrf.mxu2 }
 0x1eb   :  { %v786_v48 = vmul.f32 %v3179_v4, %v746_v19  ;;  %v1042_v50 = vmul.f32 %v3193_v54, %v968_v9  ;;  %v3197_v9 = vld [vmem:[#allocation14_spill] sm:$0xff] }
 0x1ed   :  { %v818_v49 = vadd.f32 %v786_v48, %v3180_v35  ;;  %v1074_v57 = vadd.f32 %v1042_v50, %v3194_v6  ;;  %v2723_v6 = vld [vmem:[%s3106_s1 + $0x41] ss:$0 sm:$0xff] }
 0x1ef   :  { %1913 = vmatmul.msk.f32.gmra.mxu2 %vm275_vm5, %v818_v49  ;;  %1928 = vmatmul.msk.f32.gmra.mxu3 %vm275_vm5, %v1074_v57 }
 0x1f2   :  { %v749_v25 = vpop.f32.mrf.mxu1  ;;  %v971_v11 = vpop.f32.mrf.mxu2 }
 0x1f3   :  { %v787_v31 = vmul.f32 %v3181_v52, %v749_v25  ;;  %v1043_v46 = vmul.f32 %v3195_v3, %v971_v11 }
 0x1f5   :  { %v819_v26 = vadd.f32 %v787_v31, %v3182_v5  ;;  %v1075_v39 = vadd.f32 %v1043_v46, %v3196_v34 }
 0x1f7   :  { %1914 = vmatmul.msk.f32.gmra.mxu2 %vm275_vm5, %v819_v26  ;;  %1929 = vmatmul.msk.f32.gmra.mxu3 %vm275_vm5, %v1075_v39 }
 0x1fa   :  { %v752_v10 = vpop.f32.mrf.mxu1  ;;  %v974_v32 = vpop.f32.mrf.mxu2 }
 0x1fb   :  { %v788_v14 = vmul.f32 %v3183_v53, %v752_v10  ;;  %v1044_v37 = vmul.f32 %v2227_v18, %v974_v32 }
 0x1fd   :  { %v820_v38 = vadd.f32 %v788_v14, %v3184_v1  ;;  %v1076_v45 = vadd.f32 %v1044_v37, %v2239_v24 }
 0x1ff   :  { %1915 = vmatmul.msk.f32.gmra.mxu2 %vm275_vm5, %v820_v38  ;;  %1930 = vmatmul.msk.f32.gmra.mxu3 %vm275_vm5, %v1076_v45 }
 0x202   :  { %v755_v2 = vpop.f32.mrf.mxu1  ;;  %v977_v27 = vpop.f32.mrf.mxu2 }
 0x203   :  { %v789_v13 = vmul.f32 %v2483_v22, %v755_v2  ;;  %v1045_v16 = vmul.f32 %v2245_v28, %v977_v27 }
 0x205   :  { %v821_v19 = vadd.f32 %v789_v13, %v3185_v58  ;;  %v1077_v48 = vadd.f32 %v1045_v16, %v3197_v9 }
 0x207   :  { %1916 = vmatmul.msk.f32.gmra.mxu2 %vm275_vm5, %v821_v19  ;;  %1931 = vmatmul.msk.f32.gmra.mxu3 %vm275_vm5, %v1077_v48 }
 0x20a   :  { %v980_v18 = vpop.f32.mrf.mxu2 }
 0x20b   :  { %v1046_v24 = vmul.f32 %v2255_v33, %v980_v18 }
 0x20d   :  { %v1078_v54 = vadd.f32 %v1046_v24, %v2261_v40 }
 0x20f   :  { %1932 = vmatmul.msk.f32.gmra.mxu3 %vm275_vm5, %v1078_v54 }
 0x212   :  { %v983_v50 = vpop.f32.mrf.mxu2 }
 0x213   :  { %v1047_v49 = vmul.f32 %v3186_v55, %v983_v50 }
 0x215   :  { %v1079_v28 = vadd.f32 %v1047_v49, %v2229_v20 }
 0x217   :  { %1933 = vmatmul.msk.f32.gmra.mxu3 %vm275_vm5, %v1079_v28 }
 0x21a   :  { %v986_v57 = vpop.f32.mrf.mxu2  ;;  %v1212_v21 = vpop.f32.mrf.mxu3 }
 0x21b   :  { %v1048_v33 = vmul.f32 %v2270_v42, %v986_v57  ;;  %v1213_v40 = vadd.f32 %v2723_v6, %v1212_v21 }
 0x21d   :  { %v1080_v25 = vadd.f32 %v1048_v33, %v2274_v47  ;;  %v1308_v11 = vmax.f32 %v1213_v40, 0.0 }
 0x21f   :  { %1934 = vmatmul.msk.f32.gmra.mxu3 %vm275_vm5, %v1080_v25  ;;  %1949 = vmatmul.msk.f32.vlgmr.msrb.gmra.mxu0 %vm1346_vm2, %v1308_v11 }
 0x222   :  { %v989_v20 = vpop.f32.mrf.mxu2  ;;  %v1215_v55 = vpop.f32.mrf.mxu3 }
 0x223   :  { %v1049_v31 = vmul.f32 %v2283_v51, %v989_v20  ;;  %v1216_v3 = vadd.f32 %v2723_v6, %v1215_v55 }
 0x225   :  { %v1081_v46 = vadd.f32 %v1049_v31, %v2287_v56  ;;  %v1309_v26 = vmax.f32 %v1216_v3, 0.0 }
 0x227   :  { %1935 = vmatmul.msk.f32.gmra.mxu3 %vm275_vm5, %v1081_v46  ;;  %1950 = vmatmul.msk.f32.gmra.mxu0 %vm1346_vm2, %v1309_v26 }
 0x22a   :  { %v992_v42 = vpop.f32.mrf.mxu2  ;;  %v1218_v47 = vpop.f32.mrf.mxu3 }
 0x22b   :  { %v1050_v34 = vmul.f32 %v2296_v60, %v992_v42  ;;  %v1219_v39 = vadd.f32 %v2723_v6, %v1218_v47 }
 0x22d   :  { %v1082_v10 = vadd.f32 %v1050_v34, %v2300_v63  ;;  %v1310_v32 = vmax.f32 %v1219_v39, 0.0 }
 0x22f   :  { %1936 = vmatmul.msk.f32.gmra.mxu3 %vm275_vm5, %v1082_v10  ;;  %1951 = vmatmul.msk.f32.gmra.mxu0 %vm1346_vm2, %v1310_v32 }
 0x232   :  { %v995_v51 = vpop.f32.mrf.mxu2  ;;  %v1221_v56 = vpop.f32.mrf.mxu3 }
 0x233   :  { %v1051_v14 = vmul.f32 %v2309_v7, %v995_v51  ;;  %v1222_v37 = vadd.f32 %v2723_v6, %v1221_v56 }
 0x235   :  { %v1083_v38 = vadd.f32 %v1051_v14, %v2313_v15  ;;  %v1311_v45 = vmax.f32 %v1222_v37, 0.0 }
 0x237   :  { %1937 = vmatmul.msk.f32.gmra.mxu3 %vm275_vm5, %v1083_v38  ;;  %1952 = vmatmul.msk.f32.gmra.mxu0 %vm1346_vm2, %v1311_v45 }
 0x23a   :  { %v998_v60 = vpop.f32.mrf.mxu2  ;;  %v1224_v63 = vpop.f32.mrf.mxu3 }
 0x23b   :  { %v1052_v2 = vmul.f32 %v2322_v23, %v998_v60  ;;  %v1225_v27 = vadd.f32 %v2723_v6, %v1224_v63 }
 0x23d   :  { %v1084_v13 = vadd.f32 %v1052_v2, %v2328_v36  ;;  %v1312_v16 = vmax.f32 %v1225_v27, 0.0 }
 0x23f   :  { %1938 = vmatmul.msk.f32.gmra.mxu3 %vm275_vm5, %v1084_v13  ;;  %1953 = vmatmul.msk.f32.gmra.mxu0 %vm1346_vm2, %v1312_v16 }
 0x242   :  { %v1001_v7 = vpop.f32.mrf.mxu2  ;;  %v1227_v15 = vpop.f32.mrf.mxu3 }
 0x243   :  { %v1053_v19 = vmul.f32 %v2338_v44, %v1001_v7  ;;  %v1228_v9 = vadd.f32 %v2723_v6, %v1227_v15 }
 0x245   :  { %v1085_v48 = vadd.f32 %v1053_v19, %v2344_v61  ;;  %v1313_v18 = vmax.f32 %v1228_v9, 0.0  ;;  %v2806_v19 = vld [vmem:[%s3106_s1 + $0x42] ss:$0 sm:$0xff] }
 0x247   :  { %1939 = vmatmul.msk.f32.gmra.mxu3 %vm275_vm5, %v1085_v48  ;;  %1954 = vmatmul.msk.f32.gmra.mxu0 %vm1346_vm2, %v1313_v18  ;;  %v2812_v48 = vld [vmem:[%s3106_s1 + $0x43] ss:$0 sm:$0xff] }
 0x24a   :  { %v1004_v23 = vpop.f32.mrf.mxu2  ;;  %v1230_v36 = vpop.f32.mrf.mxu3 }
 0x24b   :  { %v1054_v24 = vmul.f32 %v2354_v8, %v1004_v23  ;;  %v1231_v54 = vadd.f32 %v2723_v6, %v1230_v36 }
 0x24d   :  { %v1086_v50 = vadd.f32 %v1054_v24, %v2360_v29  ;;  %v1314_v49 = vmax.f32 %v1231_v54, 0.0 }
 0x24f   :  { %1940 = vmatmul.msk.f32.gmra.mxu3 %vm275_vm5, %v1086_v50  ;;  %1955 = vmatmul.msk.f32.gmra.mxu0 %vm1346_vm2, %v1314_v49 }
 0x252   :  { %v1007_v44 = vpop.f32.mrf.mxu2  ;;  %v1233_v61 = vpop.f32.mrf.mxu3 }
 0x253   :  { %v1055_v28 = vmul.f32 %v2370_v41, %v1007_v44  ;;  %v1234_v57 = vadd.f32 %v2723_v6, %v1233_v61 }
 0x255   :  { %v1087_v21 = vadd.f32 %v1055_v28, %v2376_v59  ;;  %v1315_v33 = vmax.f32 %v1234_v57, 0.0 }
 0x257   :  { %1941 = vmatmul.msk.f32.gmra.mxu3 %vm275_vm5, %v1087_v21  ;;  %1956 = vmatmul.msk.f32.gmra.mxu0 %vm1346_vm2, %v1315_v33 }
 0x25a   :  { %v1010_v8 = vpop.f32.mrf.mxu2  ;;  %v1236_v29 = vpop.f32.mrf.mxu3 }
 0x25b   :  { %v1056_v40 = vmul.f32 %v2386_v12, %v1010_v8  ;;  %v1237_v25 = vadd.f32 %v2723_v6, %v1236_v29 }
 0x25d   :  { %v1088_v11 = vadd.f32 %v1056_v40, %v3174_v62  ;;  %v1316_v20 = vmax.f32 %v1237_v25, 0.0 }
 0x25f   :  { %1942 = vmatmul.msk.f32.gmra.mxu3 %vm275_vm5, %v1088_v11  ;;  %1957 = vmatmul.msk.f32.gmra.mxu0 %vm1346_vm2, %v1316_v20 }
 0x262   :  { %v1013_v41 = vpop.f32.mrf.mxu2  ;;  %v1239_v59 = vpop.f32.mrf.mxu3 }
 0x263   :  { %v1057_v55 = vmul.f32 %v3175_v43, %v1013_v41  ;;  %v1240_v31 = vadd.f32 %v2723_v6, %v1239_v59 }
 0x265   :  { %v1089_v3 = vadd.f32 %v1057_v55, %v3176_v30  ;;  %v1317_v46 = vmax.f32 %v1240_v31, 0.0 }
 0x267   :  { %1943 = vmatmul.msk.f32.gmra.mxu3 %vm275_vm5, %v1089_v3  ;;  %1958 = vmatmul.msk.f32.gmra.mxu0 %vm1346_vm2, %v1317_v46 }
 0x26a   :  { %v1016_v12 = vpop.f32.mrf.mxu2  ;;  %v1242_v62 = vpop.f32.mrf.mxu3 }
 0x26b   :  { %v1058_v26 = vmul.f32 %v3177_v17, %v1016_v12  ;;  %v1243_v42 = vadd.f32 %v2723_v6, %v1242_v62 }
 0x26d   :  { %v1090_v47 = vadd.f32 %v1058_v26, %v3178_v0  ;;  %v1318_v34 = vmax.f32 %v1243_v42, 0.0 }
 0x26f   :  { %1944 = vmatmul.msk.f32.gmra.mxu3 %vm275_vm5, %v1090_v47  ;;  %1959 = vmatmul.msk.f32.gmra.mxu0 %vm1346_vm2, %v1318_v34 }
 0x272   :  { %v1019_v43 = vpop.f32.mrf.mxu2  ;;  %v1245_v30 = vpop.f32.mrf.mxu3 }
 0x273   :  { %v1059_v39 = vmul.f32 %v3179_v4, %v1019_v43  ;;  %v1246_v10 = vadd.f32 %v2723_v6, %v1245_v30 }
 0x275   :  { %v1091_v32 = vadd.f32 %v1059_v39, %v3180_v35  ;;  %v1319_v51 = vmax.f32 %v1246_v10, 0.0 }
 0x277   :  { %1945 = vmatmul.msk.f32.gmra.mxu3 %vm275_vm5, %v1091_v32  ;;  %1960 = vmatmul.msk.f32.gmra.mxu0 %vm1346_vm2, %v1319_v51 }
 0x27a   :  { %v1022_v17 = vpop.f32.mrf.mxu2  ;;  %v1248_v0 = vpop.f32.mrf.mxu3 }
 0x27b   :  { %v1060_v56 = vmul.f32 %v3181_v52, %v1022_v17  ;;  %v1249_v14 = vadd.f32 %v2723_v6, %v1248_v0 }
 0x27d   :  { %v1092_v37 = vadd.f32 %v1060_v56, %v3182_v5  ;;  %v1320_v38 = vmax.f32 %v1249_v14, 0.0 }
 0x27f   :  { %1946 = vmatmul.msk.f32.gmra.mxu3 %vm275_vm5, %v1092_v37  ;;  %1961 = vmatmul.msk.f32.gmra.mxu0 %vm1346_vm2, %v1320_v38 }
 0x282   :  { %v1025_v4 = vpop.f32.mrf.mxu2  ;;  %v1251_v35 = vpop.f32.mrf.mxu3 }
 0x283   :  { %v1061_v45 = vmul.f32 %v3183_v53, %v1025_v4  ;;  %v1252_v60 = vadd.f32 %v2723_v6, %v1251_v35 }
 0x285   :  { %v1093_v63 = vadd.f32 %v1061_v45, %v3184_v1  ;;  %v1321_v2 = vmax.f32 %v1252_v60, 0.0 }
 0x287   :  { %1947 = vmatmul.msk.f32.gmra.mxu3 %vm275_vm5, %v1093_v63  ;;  %1962 = vmatmul.msk.f32.gmra.mxu0 %vm1346_vm2, %v1321_v2 }
 0x28a   :  { %v1028_v52 = vpop.f32.mrf.mxu2  ;;  %v1254_v5 = vpop.f32.mrf.mxu3 }
 0x28b   :  { %v1062_v27 = vmul.f32 %v2483_v22, %v1028_v52  ;;  %v1255_v13 = vadd.f32 %v2723_v6, %v1254_v5 }
 0x28d   :  { %v1094_v16 = vadd.f32 %v1062_v27, %v3185_v58  ;;  %v1322_v7 = vmax.f32 %v1255_v13, 0.0 }
 0x28f   :  { %1948 = vmatmul.msk.f32.gmra.mxu3 %vm275_vm5, %v1094_v16  ;;  %1963 = vmatmul.msk.f32.gmra.mxu0 %vm1346_vm2, %v1322_v7  ;;  %vm1752_vm5 = vcmask 7168  }
 0x292   :  { %v1257_v53 = vpop.f32.mrf.mxu3 }
 0x293   :  { %v1258_v1 = vadd.f32 %v2723_v6, %v1257_v53 }
 0x295   :  { %v1323_v15 = vmax.f32 %v1258_v1, 0.0 }
 0x297   :  { %1964 = vmatmul.msk.f32.gmra.mxu0 %vm1346_vm2, %v1323_v15 }
 0x29a   :  { %v1260_v22 = vpop.f32.mrf.mxu3 }
 0x29b   :  { %v1261_v9 = vadd.f32 %v2723_v6, %v1260_v22 }
 0x29c   :  { %v1460_v58 = vpop.f32.mrf.mxu0 }
 0x29d   :  { %v1324_v18 = vmax.f32 %v1261_v9, 0.0  ;;  %v1461_v23 = vadd.f32 %v2806_v19, %v1460_v58 }
 0x29f   :  { %v1556_v36 = vmax.f32 %v1461_v23, 0.0  ;;  %1965 = vmatmul.msk.f32.gmra.mxu0 %vm1346_vm2, %v1324_v18 }
 0x2a1   :  { %v1590_v24 = vmul.f32 %v2812_v48, %v1556_v36 }
 0x2a2   :  { %v1263_v54 = vpop.f32.mrf.mxu3 }
 0x2a3   :  { %v1264_v50 = vadd.f32 %v2723_v6, %v1263_v54  ;;  %v1622_v49 = vsel %vm1346_vm2, %v1590_v24, 0.0 }
 0x2a4   :  { %v1463_v44 = vpop.f32.mrf.mxu0  ;;  %1623 = vadd.xlane.f32.xlu0 %v1622_v49 }
 0x2a5   :  { %v1325_v61 = vmax.f32 %v1264_v50, 0.0  ;;  %v1464_v28 = vadd.f32 %v2806_v19, %v1463_v44 }
 0x2a7   :  { %v1557_v57 = vmax.f32 %v1464_v28, 0.0  ;;  %1966 = vmatmul.msk.f32.gmra.mxu0 %vm1346_vm2, %v1325_v61 }
 0x2a9   :  { %v1591_v21 = vmul.f32 %v2812_v48, %v1557_v57 }
 0x2aa   :  { %v1266_v33 = vpop.f32.mrf.mxu3 }
 0x2ab   :  { %v1267_v8 = vadd.f32 %v2723_v6, %v1266_v33  ;;  %v1625_v29 = vsel %vm1346_vm2, %v1591_v21, 0.0 }
 0x2ac   :  { %v1466_v40 = vpop.f32.mrf.mxu0  ;;  %1626 = vadd.xlane.f32.xlu0 %v1625_v29 }
 0x2ad   :  { %v1326_v25 = vmax.f32 %v1267_v8, 0.0  ;;  %v1467_v11 = vadd.f32 %v2806_v19, %v1466_v40 }
 0x2af   :  { %v1558_v20 = vmax.f32 %v1467_v11, 0.0  ;;  %1967 = vmatmul.msk.f32.gmra.mxu0 %vm1346_vm2, %v1326_v25 }
 0x2b1   :  { %v1592_v41 = vmul.f32 %v2812_v48, %v1558_v20 }
 0x2b2   :  { %v1269_v59 = vpop.f32.mrf.mxu3 }
 0x2b3   :  { %v1270_v55 = vadd.f32 %v2723_v6, %v1269_v59  ;;  %v1628_v31 = vsel %vm1346_vm2, %v1592_v41, 0.0 }
 0x2b4   :  { %v1469_v3 = vpop.f32.mrf.mxu0  ;;  %1629 = vadd.xlane.f32.xlu1 %v1628_v31 }
 0x2b5   :  { %v1327_v46 = vmax.f32 %v1270_v55, 0.0  ;;  %v1470_v12 = vadd.f32 %v2806_v19, %v1469_v3 }
 0x2b7   :  { %v1559_v62 = vmax.f32 %v1470_v12, 0.0  ;;  %1968 = vmatmul.msk.f32.gmra.mxu0 %vm1346_vm2, %v1327_v46 }
 0x2b9   :  { %v1593_v26 = vmul.f32 %v2812_v48, %v1559_v62 }
 0x2ba   :  { %v1272_v42 = vpop.f32.mrf.mxu3 }
 0x2bb   :  { %v1273_v47 = vadd.f32 %v2723_v6, %v1272_v42  ;;  %v1631_v34 = vsel %vm1346_vm2, %v1593_v26, 0.0 }
 0x2bc   :  { %v1472_v43 = vpop.f32.mrf.mxu0  ;;  %1632 = vadd.xlane.f32.xlu1 %v1631_v34 }
 0x2bd   :  { %v1328_v30 = vmax.f32 %v1273_v47, 0.0  ;;  %v1473_v39 = vadd.f32 %v2806_v19, %v1472_v43 }
 0x2bf   :  { %v1560_v10 = vmax.f32 %v1473_v39, 0.0  ;;  %1969 = vmatmul.msk.f32.gmra.mxu0 %vm1346_vm2, %v1328_v30 }
 0x2c1   :  { %v1594_v32 = vmul.f32 %v2812_v48, %v1560_v10 }
 0x2c2   :  { %v1275_v51 = vpop.f32.mrf.mxu3 }
 0x2c3   :  { %v1276_v17 = vadd.f32 %v2723_v6, %v1275_v51  ;;  %v1634_v0 = vsel %vm1346_vm2, %v1594_v32, 0.0 }
 0x2c4   :  { %v1475_v56 = vpop.f32.mrf.mxu0  ;;  %1635 = vadd.xlane.f32.xlu2 %v1634_v0 }
 0x2c5   :  { %v1329_v14 = vmax.f32 %v1276_v17, 0.0  ;;  %v1476_v37 = vadd.f32 %v2806_v19, %v1475_v56 }
 0x2c7   :  { %v1561_v38 = vmax.f32 %v1476_v37, 0.0  ;;  %1970 = vmatmul.msk.f32.gmra.mxu0 %vm1346_vm2, %v1329_v14 }
 0x2c9   :  { %v1595_v4 = vmul.f32 %v2812_v48, %v1561_v38 }
 0x2ca   :  { %v1278_v35 = vpop.f32.mrf.mxu3 }
 0x2cb   :  { %v1279_v45 = vadd.f32 %v2723_v6, %v1278_v35  ;;  %v1637_v60 = vsel %vm1346_vm2, %v1595_v4, 0.0 }
 0x2cc   :  { %v1478_v63 = vpop.f32.mrf.mxu0  ;;  %1638 = vadd.xlane.f32.xlu2 %v1637_v60 }
 0x2cd   :  { %v1330_v2 = vmax.f32 %v1279_v45, 0.0  ;;  %v1479_v52 = vadd.f32 %v2806_v19, %v1478_v63 }
 0x2cf   :  { %v1562_v5 = vmax.f32 %v1479_v52, 0.0  ;;  %1971 = vmatmul.msk.f32.gmra.mxu0 %vm1346_vm2, %v1330_v2 }
 0x2d1   :  { %v1596_v27 = vmul.f32 %v2812_v48, %v1562_v5 }
 0x2d2   :  { %v1281_v13 = vpop.f32.mrf.mxu3 }
 0x2d3   :  { %v1282_v16 = vadd.f32 %v2723_v6, %v1281_v13  ;;  %v1640_v7 = vsel %vm1346_vm2, %v1596_v27, 0.0 }
 0x2d4   :  { %1641 = vadd.xlane.f32.xlu0 %v1640_v7  ;;  %v1481_v53 = vpop.f32.mrf.mxu0 }
 0x2d5   :  { %v1331_v1 = vmax.f32 %v1282_v16, 0.0  ;;  %v1482_v15 = vadd.f32 %v2806_v19, %v1481_v53 }
 0x2d7   :  { %v1563_v22 = vmax.f32 %v1482_v15, 0.0  ;;  %1972 = vmatmul.msk.f32.gmra.mxu0 %vm1346_vm2, %v1331_v1 }
 0x2d9   :  { %v1597_v9 = vmul.f32 %v2812_v48, %v1563_v22 }
 0x2da   :  { %v1284_v58 = vpop.f32.mrf.mxu3 }
 0x2db   :  { %v1285_v18 = vadd.f32 %v2723_v6, %v1284_v58  ;;  %v1643_v23 = vsel %vm1346_vm2, %v1597_v9, 0.0 }
 0x2dc   :  { %1644 = vadd.xlane.f32.xlu1 %v1643_v23  ;;  %v1484_v36 = vpop.f32.mrf.mxu0 }
 0x2dd   :  { %v1332_v24 = vmax.f32 %v1285_v18, 0.0  ;;  %v1485_v54 = vadd.f32 %v2806_v19, %v1484_v36  ;;  %v2893_v18 = vstv %s3108_s2 }
 0x2df   :  { %v1564_v50 = vmax.f32 %v1485_v54, 0.0  ;;  %1973 = vmatmul.msk.f32.gmra.mxu0 %vm1346_vm2, %v1332_v24 }
 0x2e1   :  { %v1598_v49 = vmul.f32 %v2812_v48, %v1564_v50 }
 0x2e2   :  { %v1287_v44 = vpop.f32.mrf.mxu3 }
 0x2e3   :  { %v1288_v61 = vadd.f32 %v2723_v6, %v1287_v44  ;;  %v1646_v28 = vsel %vm1346_vm2, %v1598_v49, 0.0 }
 0x2e4   :  { %1647 = vadd.xlane.f32.xlu2 %v1646_v28  ;;  %v1487_v57 = vpop.f32.mrf.mxu0 }
 0x2e5   :  { %v1333_v21 = vmax.f32 %v1288_v61, 0.0  ;;  %v1488_v33 = vadd.f32 %v2806_v19, %v1487_v57 }
 0x2e7   :  { %v1565_v8 = vmax.f32 %v1488_v33, 0.0  ;;  %1974 = vmatmul.msk.f32.gmra.mxu0 %vm1346_vm2, %v1333_v21 }
 0x2e9   :  { %v1599_v29 = vmul.f32 %v2812_v48, %v1565_v8 }
 0x2ea   :  { %v1290_v40 = vpop.f32.mrf.mxu3 }
 0x2eb   :  { %v1291_v25 = vadd.f32 %v2723_v6, %v1290_v40  ;;  %v1649_v11 = vsel %vm1346_vm2, %v1599_v29, 0.0 }
 0x2ec   :  { %1650 = vadd.xlane.f32.xlu0 %v1649_v11  ;;  %v1490_v20 = vpop.f32.mrf.mxu0 }
 0x2ed   :  { %v1334_v41 = vmax.f32 %v1291_v25, 0.0  ;;  %v1491_v59 = vadd.f32 %v2806_v19, %v1490_v20 }
 0x2ef   :  { %v1566_v55 = vmax.f32 %v1491_v59, 0.0  ;;  %1975 = vmatmul.msk.f32.gmra.mxu0 %vm1346_vm2, %v1334_v41 }
 0x2f1   :  { %v1600_v31 = vmul.f32 %v2812_v48, %v1566_v55 }
 0x2f2   :  { %v1293_v3 = vpop.f32.mrf.mxu3 }
 0x2f3   :  { %v1294_v46 = vadd.f32 %v2723_v6, %v1293_v3  ;;  %v1652_v12 = vsel %vm1346_vm2, %v1600_v31, 0.0 }
 0x2f4   :  { %1653 = vadd.xlane.f32.xlu1 %v1652_v12  ;;  %v1493_v62 = vpop.f32.mrf.mxu0 }
 0x2f5   :  { %v1335_v26 = vmax.f32 %v1294_v46, 0.0  ;;  %v1494_v42 = vadd.f32 %v2806_v19, %v1493_v62 }
 0x2f7   :  { %v1567_v47 = vmax.f32 %v1494_v42, 0.0  ;;  %1976 = vmatmul.msk.f32.gmra.mxu0 %vm1346_vm2, %v1335_v26 }
 0x2f9   :  { %v1601_v34 = vmul.f32 %v2812_v48, %v1567_v47 }
 0x2fa   :  { %v1296_v43 = vpop.f32.mrf.mxu3 }
 0x2fb   :  { %v1297_v30 = vadd.f32 %v2723_v6, %v1296_v43  ;;  %v1655_v39 = vsel %vm1346_vm2, %v1601_v34, 0.0 }
 0x2fc   :  { %1656 = vadd.xlane.f32.xlu2 %v1655_v39  ;;  %v1496_v10 = vpop.f32.mrf.mxu0 }
 0x2fd   :  { %v1336_v32 = vmax.f32 %v1297_v30, 0.0  ;;  %v1497_v51 = vadd.f32 %v2806_v19, %v1496_v10 }
 0x2ff   :  { %v1568_v17 = vmax.f32 %v1497_v51, 0.0  ;;  %1977 = vmatmul.msk.f32.gmra.mxu0 %vm1346_vm2, %v1336_v32 }
 0x301   :  { %v1602_v0 = vmul.f32 %v2812_v48, %v1568_v17 }
 0x302   :  { %v1299_v56 = vpop.f32.mrf.mxu3 }
 0x303   :  { %v1300_v14 = vadd.f32 %v2723_v6, %v1299_v56  ;;  %v1658_v37 = vsel %vm1346_vm2, %v1602_v0, 0.0 }
 0x304   :  { %1659 = vadd.xlane.f32.xlu0 %v1658_v37  ;;  %v1499_v38 = vpop.f32.mrf.mxu0 }
 0x305   :  { %v1337_v4 = vmax.f32 %v1300_v14, 0.0  ;;  %v1500_v35 = vadd.f32 %v2806_v19, %v1499_v38 }
 0x307   :  { %v1569_v45 = vmax.f32 %v1500_v35, 0.0  ;;  %1978 = vmatmul.msk.f32.gmra.mxu0 %vm1346_vm2, %v1337_v4 }
 0x309   :  { %v1603_v60 = vmul.f32 %v2812_v48, %v1569_v45 }
 0x30a   :  { %v1302_v63 = vpop.f32.mrf.mxu3 }
 0x30b   :  { %v1303_v2 = vadd.f32 %v2723_v6, %v1302_v63  ;;  %v1661_v52 = vsel %vm1346_vm2, %v1603_v60, 0.0 }
 0x30c   :  { %1662 = vadd.xlane.f32.xlu1 %v1661_v52  ;;  %v1502_v5 = vpop.f32.mrf.mxu0 }
 0x30d   :  { %v1338_v27 = vmax.f32 %v1303_v2, 0.0  ;;  %v1503_v13 = vadd.f32 %v2806_v19, %v1502_v5 }
 0x30f   :  { %v1570_v16 = vmax.f32 %v1503_v13, 0.0  ;;  %1979 = vmatmul.msk.f32.gmra.mxu0 %vm1346_vm2, %v1338_v27 }
 0x311   :  { %v1604_v7 = vmul.f32 %v2812_v48, %v1570_v16 }
 0x312   :  { %v1305_v53 = vpop.f32.mrf.mxu3 }
 0x313   :  { %v1306_v1 = vadd.f32 %v2723_v6, %v1305_v53  ;;  %v1664_v15 = vsel %vm1346_vm2, %v1604_v7, 0.0 }
 0x314   :  { %1665 = vadd.xlane.f32.xlu2 %v1664_v15  ;;  %v1505_v22 = vpop.f32.mrf.mxu0 }
 0x315   :  { %v1339_v9 = vmax.f32 %v1306_v1, 0.0  ;;  %v1506_v58 = vadd.f32 %v2806_v19, %v1505_v22 }
 0x317   :  { %v1571_v23 = vmax.f32 %v1506_v58, 0.0  ;;  %v1624_v36 = vpop.xlane.xlu0 %1623  ;;  %1980 = vmatmul.msk.f32.gmra.mxu0 %vm1346_vm2, %v1339_v9 }
 0x318   :  { %v1720_v24 = vadd.f32 %v2893_v18, %v1624_v36 }
 0x319   :  { %v1605_v6 = vmul.f32 %v2812_v48, %v1571_v23 }
 0x31a   :  { %1753 = vst.msk [vmem:[%s3109_s3] sm:$0xff] %vm1752_vm5, %v1720_v24 }
 0x31b   :  { %v1667_v54 = vsel %vm1346_vm2, %v1605_v6, 0.0 }
 0x31c   :  { %1668 = vadd.xlane.f32.xlu0 %v1667_v54  ;;  %v1508_v50 = vpop.f32.mrf.mxu0 }
 0x31d   :  { %v1509_v49 = vadd.f32 %v2806_v19, %v1508_v50 }
 0x31f   :  { %v1572_v44 = vmax.f32 %v1509_v49, 0.0  ;;  %v1627_v61 = vpop.xlane.xlu0 %1626 }
 0x320   :  { %v1721_v28 = vadd.f32 %v2893_v18, %v1627_v61 }
 0x321   :  { %v1606_v57 = vmul.f32 %v2812_v48, %v1572_v44 }
 0x322   :  { %1754 = vst.msk [vmem:[%s3109_s3 + $0x8] sm:$0xff] %vm1752_vm5, %v1721_v28 }
 0x323   :  { %v1670_v21 = vsel %vm1346_vm2, %v1606_v57, 0.0 }
 0x324   :  { %1671 = vadd.xlane.f32.xlu1 %v1670_v21  ;;  %v1511_v33 = vpop.f32.mrf.mxu0 }
 0x325   :  { %v1512_v8 = vadd.f32 %v2806_v19, %v1511_v33 }
 0x327   :  { %v1573_v29 = vmax.f32 %v1512_v8, 0.0  ;;  %v1630_v40 = vpop.xlane.xlu1 %1629 }
 0x328   :  { %v1722_v25 = vadd.f32 %v2893_v18, %v1630_v40 }
 0x329   :  { %v1607_v11 = vmul.f32 %v2812_v48, %v1573_v29 }
 0x32a   :  { %1755 = vst.msk [vmem:[%s3109_s3 + $0x10] sm:$0xff] %vm1752_vm5, %v1722_v25 }
 0x32b   :  { %v1673_v20 = vsel %vm1346_vm2, %v1607_v11, 0.0 }
 0x32c   :  { %1674 = vadd.xlane.f32.xlu2 %v1673_v20  ;;  %v1514_v41 = vpop.f32.mrf.mxu0 }
 0x32d   :  { %v1515_v59 = vadd.f32 %v2806_v19, %v1514_v41 }
 0x32f   :  { %v1574_v55 = vmax.f32 %v1515_v59, 0.0  ;;  %v1633_v31 = vpop.xlane.xlu1 %1632 }
 0x330   :  { %v1723_v3 = vadd.f32 %v2893_v18, %v1633_v31 }
 0x331   :  { %v1608_v46 = vmul.f32 %v2812_v48, %v1574_v55 }
 0x332   :  { %1756 = vst.msk [vmem:[%s3109_s3 + $0x18] sm:$0xff] %vm1752_vm5, %v1723_v3 }
 0x333   :  { %v1676_v12 = vsel %vm1346_vm2, %v1608_v46, 0.0 }
 0x334   :  { %1677 = vadd.xlane.f32.xlu0 %v1676_v12  ;;  %v1517_v62 = vpop.f32.mrf.mxu0 }
 0x335   :  { %v1518_v26 = vadd.f32 %v2806_v19, %v1517_v62 }
 0x337   :  { %v1575_v42 = vmax.f32 %v1518_v26, 0.0  ;;  %v1636_v47 = vpop.xlane.xlu2 %1635 }
 0x338   :  { %v1724_v34 = vadd.f32 %v2893_v18, %v1636_v47 }
 0x339   :  { %v1609_v43 = vmul.f32 %v2812_v48, %v1575_v42 }
 0x33a   :  { %1757 = vst.msk [vmem:[%s3109_s3 + $0x20] sm:$0xff] %vm1752_vm5, %v1724_v34 }
 0x33b   :  { %v1679_v30 = vsel %vm1346_vm2, %v1609_v43, 0.0 }
 0x33c   :  { %1680 = vadd.xlane.f32.xlu1 %v1679_v30  ;;  %v1520_v39 = vpop.f32.mrf.mxu0 }
 0x33d   :  { %v1521_v10 = vadd.f32 %v2806_v19, %v1520_v39 }
 0x33f   :  { %v1576_v32 = vmax.f32 %v1521_v10, 0.0  ;;  %v1639_v51 = vpop.xlane.xlu2 %1638 }
 0x340   :  { %v1725_v17 = vadd.f32 %v2893_v18, %v1639_v51 }
 0x341   :  { %v1610_v0 = vmul.f32 %v2812_v48, %v1576_v32 }
 0x342   :  { %1758 = vst.msk [vmem:[%s3109_s3 + $0x28] sm:$0xff] %vm1752_vm5, %v1725_v17 }
 0x343   :  { %v1682_v56 = vsel %vm1346_vm2, %v1610_v0, 0.0 }
 0x344   :  { %1683 = vadd.xlane.f32.xlu2 %v1682_v56  ;;  %v1523_v14 = vpop.f32.mrf.mxu0 }
 0x345   :  { %v1524_v37 = vadd.f32 %v2806_v19, %v1523_v14 }
 0x347   :  { %v1577_v38 = vmax.f32 %v1524_v37, 0.0  ;;  %v1642_v4 = vpop.xlane.xlu0 %1641 }
 0x348   :  { %v1726_v35 = vadd.f32 %v2893_v18, %v1642_v4 }
 0x349   :  { %v1611_v45 = vmul.f32 %v2812_v48, %v1577_v38 }
 0x34a   :  { %1759 = vst.msk [vmem:[%s3109_s3 + $0x30] sm:$0xff] %vm1752_vm5, %v1726_v35 }
 0x34b   :  { %v1685_v60 = vsel %vm1346_vm2, %v1611_v45, 0.0 }
 0x34c   :  { %1686 = vadd.xlane.f32.xlu0 %v1685_v60  ;;  %v1526_v63 = vpop.f32.mrf.mxu0 }
 0x34d   :  { %v1527_v2 = vadd.f32 %v2806_v19, %v1526_v63 }
 0x34f   :  { %v1578_v52 = vmax.f32 %v1527_v2, 0.0  ;;  %v1645_v5 = vpop.xlane.xlu1 %1644 }
 0x350   :  { %v1727_v27 = vadd.f32 %v2893_v18, %v1645_v5 }
 0x351   :  { %v1612_v13 = vmul.f32 %v2812_v48, %v1578_v52 }
 0x352   :  { %1760 = vst.msk [vmem:[%s3109_s3 + $0x38] sm:$0xff] %vm1752_vm5, %v1727_v27 }
 0x353   :  { %v1688_v16 = vsel %vm1346_vm2, %v1612_v13, 0.0 }
 0x354   :  { %1689 = vadd.xlane.f32.xlu1 %v1688_v16  ;;  %v1529_v7 = vpop.f32.mrf.mxu0 }
 0x355   :  { %v1530_v53 = vadd.f32 %v2806_v19, %v1529_v7 }
 0x357   :  { %v1579_v1 = vmax.f32 %v1530_v53, 0.0  ;;  %v1648_v15 = vpop.xlane.xlu2 %1647 }
 0x358   :  { %v1728_v22 = vadd.f32 %v2893_v18, %v1648_v15 }
 0x359   :  { %v1613_v9 = vmul.f32 %v2812_v48, %v1579_v1 }
 0x35a   :  { %1761 = vst.msk [vmem:[%s3109_s3 + $0x40] sm:$0xff] %vm1752_vm5, %v1728_v22 }
 0x35b   :  { %v1691_v58 = vsel %vm1346_vm2, %v1613_v9, 0.0 }
 0x35c   :  { %1692 = vadd.xlane.f32.xlu2 %v1691_v58  ;;  %v1532_v23 = vpop.f32.mrf.mxu0 }
 0x35d   :  { %v1533_v36 = vadd.f32 %v2806_v19, %v1532_v23 }
 0x35f   :  { %v1580_v24 = vmax.f32 %v1533_v36, 0.0  ;;  %v1651_v6 = vpop.xlane.xlu0 %1650 }
 0x360   :  { %v1729_v54 = vadd.f32 %v2893_v18, %v1651_v6 }
 0x361   :  { %v1614_v50 = vmul.f32 %v2812_v48, %v1580_v24 }
 0x362   :  { %1762 = vst.msk [vmem:[%s3109_s3 + $0x48] sm:$0xff] %vm1752_vm5, %v1729_v54 }
 0x363   :  { %v1694_v49 = vsel %vm1346_vm2, %v1614_v50, 0.0 }
 0x364   :  { %1695 = vadd.xlane.f32.xlu0 %v1694_v49  ;;  %v1535_v44 = vpop.f32.mrf.mxu0 }
 0x365   :  { %v1536_v61 = vadd.f32 %v2806_v19, %v1535_v44 }
 0x367   :  { %v1581_v28 = vmax.f32 %v1536_v61, 0.0  ;;  %v1654_v57 = vpop.xlane.xlu1 %1653 }
 0x368   :  { %v1730_v21 = vadd.f32 %v2893_v18, %v1654_v57 }
 0x369   :  { %v1615_v33 = vmul.f32 %v2812_v48, %v1581_v28 }
 0x36a   :  { %1763 = vst.msk [vmem:[%s3109_s3 + $0x50] sm:$0xff] %vm1752_vm5, %v1730_v21 }
 0x36b   :  { %v1697_v8 = vsel %vm1346_vm2, %v1615_v33, 0.0 }
 0x36c   :  { %1698 = vadd.xlane.f32.xlu1 %v1697_v8  ;;  %v1538_v29 = vpop.f32.mrf.mxu0 }
 0x36d   :  { %v1539_v40 = vadd.f32 %v2806_v19, %v1538_v29 }
 0x36f   :  { %v1582_v25 = vmax.f32 %v1539_v40, 0.0  ;;  %v1657_v11 = vpop.xlane.xlu2 %1656 }
 0x370   :  { %v1731_v20 = vadd.f32 %v2893_v18, %v1657_v11 }
 0x371   :  { %v1616_v41 = vmul.f32 %v2812_v48, %v1582_v25 }
 0x372   :  { %1764 = vst.msk [vmem:[%s3109_s3 + $0x58] sm:$0xff] %vm1752_vm5, %v1731_v20 }
 0x373   :  { %v1700_v59 = vsel %vm1346_vm2, %v1616_v41, 0.0 }
 0x374   :  { %1701 = vadd.xlane.f32.xlu2 %v1700_v59  ;;  %v1541_v55 = vpop.f32.mrf.mxu0 }
 0x375   :  { %v1542_v31 = vadd.f32 %v2806_v19, %v1541_v55 }
 0x377   :  { %v1583_v3 = vmax.f32 %v1542_v31, 0.0  ;;  %v1660_v46 = vpop.xlane.xlu0 %1659 }
 0x378   :  { %v1732_v12 = vadd.f32 %v2893_v18, %v1660_v46 }
 0x379   :  { %v1617_v62 = vmul.f32 %v2812_v48, %v1583_v3 }
 0x37a   :  { %1765 = vst.msk [vmem:[%s3109_s3 + $0x60] sm:$0xff] %vm1752_vm5, %v1732_v12 }
 0x37b   :  { %v1703_v26 = vsel %vm1346_vm2, %v1617_v62, 0.0 }
 0x37c   :  { %1704 = vadd.xlane.f32.xlu0 %v1703_v26  ;;  %v1544_v42 = vpop.f32.mrf.mxu0 }
 0x37d   :  { %v1545_v47 = vadd.f32 %v2806_v19, %v1544_v42 }
 0x37f   :  { %v1584_v34 = vmax.f32 %v1545_v47, 0.0  ;;  %v1663_v43 = vpop.xlane.xlu1 %1662 }
 0x380   :  { %v1733_v30 = vadd.f32 %v2893_v18, %v1663_v43 }
 0x381   :  { %v1618_v39 = vmul.f32 %v2812_v48, %v1584_v34 }
 0x382   :  { %1766 = vst.msk [vmem:[%s3109_s3 + $0x68] sm:$0xff] %vm1752_vm5, %v1733_v30 }
 0x383   :  { %v1706_v10 = vsel %vm1346_vm2, %v1618_v39, 0.0 }
 0x384   :  { %1707 = vadd.xlane.f32.xlu1 %v1706_v10  ;;  %v1547_v32 = vpop.f32.mrf.mxu0 }
 0x385   :  { %v1548_v51 = vadd.f32 %v2806_v19, %v1547_v32 }
 0x387   :  { %v1585_v17 = vmax.f32 %v1548_v51, 0.0  ;;  %v1666_v0 = vpop.xlane.xlu2 %1665 }
 0x388   :  { %v1734_v56 = vadd.f32 %v2893_v18, %v1666_v0 }
 0x389   :  { %v1619_v14 = vmul.f32 %v2812_v48, %v1585_v17 }
 0x38a   :  { %1767 = vst.msk [vmem:[%s3109_s3 + $0x70] sm:$0xff] %vm1752_vm5, %v1734_v56 }
 0x38b   :  { %v1709_v37 = vsel %vm1346_vm2, %v1619_v14, 0.0 }
 0x38c   :  { %1710 = vadd.xlane.f32.xlu2 %v1709_v37  ;;  %v1550_v38 = vpop.f32.mrf.mxu0 }
 0x38d   :  { %v1551_v4 = vadd.f32 %v2806_v19, %v1550_v38 }
 0x38f   :  { %v1586_v35 = vmax.f32 %v1551_v4, 0.0  ;;  %v1669_v45 = vpop.xlane.xlu0 %1668 }
 0x390   :  { %v1735_v60 = vadd.f32 %v2893_v18, %v1669_v45 }
 0x391   :  { %v1620_v63 = vmul.f32 %v2812_v48, %v1586_v35 }
 0x392   :  { %1768 = vst.msk [vmem:[%s3109_s3 + $0x78] sm:$0xff] %vm1752_vm5, %v1735_v60 }
 0x393   :  { %v1712_v2 = vsel %vm1346_vm2, %v1620_v63, 0.0 }
 0x394   :  { %1713 = vadd.xlane.f32.xlu0 %v1712_v2  ;;  %v1553_v52 = vpop.f32.mrf.mxu0 }
 0x395   :  { %v1554_v5 = vadd.f32 %v2806_v19, %v1553_v52 }
 0x397   :  { %v1587_v27 = vmax.f32 %v1554_v5, 0.0  ;;  %v1672_v13 = vpop.xlane.xlu1 %1671 }
 0x398   :  { %v1736_v16 = vadd.f32 %v2893_v18, %v1672_v13 }
 0x399   :  { %v1621_v7 = vmul.f32 %v2812_v48, %v1587_v27 }
 0x39a   :  { %1769 = vst.msk [vmem:[%s3109_s3 + $0x80] sm:$0xff] %vm1752_vm5, %v1736_v16 }
 0x39b   :  { %v1715_v53 = vsel %vm1346_vm2, %v1621_v7, 0.0 }
 0x39c   :  { %1716 = vadd.xlane.f32.xlu1 %v1715_v53 }
 0x39f   :  { %v1675_v1 = vpop.xlane.xlu2 %1674 }
 0x3a0   :  { %v1737_v15 = vadd.f32 %v2893_v18, %v1675_v1 }
 0x3a2   :  { %1770 = vst.msk [vmem:[%s3109_s3 + $0x88] sm:$0xff] %vm1752_vm5, %v1737_v15 }
 0x3a7   :  { %v1678_v19 = vpop.xlane.xlu0 %1677 }
 0x3a8   :  { %v1738_v22 = vadd.f32 %v2893_v18, %v1678_v19 }
 0x3aa   :  { %1771 = vst.msk [vmem:[%s3109_s3 + $0x90] sm:$0xff] %vm1752_vm5, %v1738_v22 }
 0x3af   :  { %v1681_v48 = vpop.xlane.xlu1 %1680 }
 0x3b0   :  { %v1739_v9 = vadd.f32 %v2893_v18, %v1681_v48 }
 0x3b2   :  { %1772 = vst.msk [vmem:[%s3109_s3 + $0x98] sm:$0xff] %vm1752_vm5, %v1739_v9 }
 0x3b7   :  { %v1684_v58 = vpop.xlane.xlu2 %1683 }
 0x3b8   :  { %v1740_v23 = vadd.f32 %v2893_v18, %v1684_v58 }
 0x3ba   :  { %1773 = vst.msk [vmem:[%s3109_s3 + $0xa0] sm:$0xff] %vm1752_vm5, %v1740_v23 }
 0x3bf   :  { %v1687_v36 = vpop.xlane.xlu0 %1686 }
 0x3c0   :  { %v1741_v24 = vadd.f32 %v2893_v18, %v1687_v36 }
 0x3c2   :  { %1774 = vst.msk [vmem:[%s3109_s3 + $0xa8] sm:$0xff] %vm1752_vm5, %v1741_v24 }
 0x3c7   :  { %v1690_v6 = vpop.xlane.xlu1 %1689 }
 0x3c8   :  { %v1742_v54 = vadd.f32 %v2893_v18, %v1690_v6 }
 0x3ca   :  { %1775 = vst.msk [vmem:[%s3109_s3 + $0xb0] sm:$0xff] %vm1752_vm5, %v1742_v54 }
 0x3cf   :  { %v1693_v50 = vpop.xlane.xlu2 %1692 }
 0x3d0   :  { %v1743_v49 = vadd.f32 %v2893_v18, %v1693_v50 }
 0x3d2   :  { %1776 = vst.msk [vmem:[%s3109_s3 + $0xb8] sm:$0xff] %vm1752_vm5, %v1743_v49 }
 0x3d7   :  { %v1696_v44 = vpop.xlane.xlu0 %1695 }
 0x3d8   :  { %v1744_v61 = vadd.f32 %v2893_v18, %v1696_v44 }
 0x3da   :  { %1777 = vst.msk [vmem:[%s3109_s3 + $0xc0] sm:$0xff] %vm1752_vm5, %v1744_v61 }
 0x3df   :  { %v1699_v28 = vpop.xlane.xlu1 %1698 }
 0x3e0   :  { %v1745_v57 = vadd.f32 %v2893_v18, %v1699_v28 }
 0x3e2   :  { %1778 = vst.msk [vmem:[%s3109_s3 + $0xc8] sm:$0xff] %vm1752_vm5, %v1745_v57 }
 0x3e7   :  { %v1702_v21 = vpop.xlane.xlu2 %1701 }
 0x3e8   :  { %v1746_v33 = vadd.f32 %v2893_v18, %v1702_v21 }
 0x3ea   :  { %1779 = vst.msk [vmem:[%s3109_s3 + $0xd0] sm:$0xff] %vm1752_vm5, %v1746_v33 }
 0x3ef   :  { %v1705_v8 = vpop.xlane.xlu0 %1704 }
 0x3f0   :  { %v1747_v29 = vadd.f32 %v2893_v18, %v1705_v8 }
 0x3f2   :  { %1780 = vst.msk [vmem:[%s3109_s3 + $0xd8] sm:$0xff] %vm1752_vm5, %v1747_v29 }
 0x3f7   :  { %v1708_v40 = vpop.xlane.xlu1 %1707 }
 0x3f8   :  { %v1748_v25 = vadd.f32 %v2893_v18, %v1708_v40 }
 0x3fa   :  { %1781 = vst.msk [vmem:[%s3109_s3 + $0xe0] sm:$0xff] %vm1752_vm5, %v1748_v25 }
 0x3ff   :  { %v1711_v11 = vpop.xlane.xlu2 %1710 }
 0x400   :  { %v1749_v20 = vadd.f32 %v2893_v18, %v1711_v11 }
 0x402   :  { %1782 = vst.msk [vmem:[%s3109_s3 + $0xe8] sm:$0xff] %vm1752_vm5, %v1749_v20 }
 0x407   :  { %v1714_v41 = vpop.xlane.xlu0 %1713 }
 0x408   :  { %v1750_v59 = vadd.f32 %v2893_v18, %v1714_v41 }
 0x40a   :  { %1783 = vst.msk [vmem:[%s3109_s3 + $0xf0] sm:$0xff] %vm1752_vm5, %v1750_v59 }
 0x40f   :  { %v1717_v55 = vpop.xlane.xlu1 %1716 }
 0x410   :  { %v1751_v31 = vadd.f32 %v2893_v18, %v1717_v55 }
 0x412   :  { %1784 = vst.msk [vmem:[%s3109_s3 + $0xf8] sm:$0xff] %vm1752_vm5, %v1751_v31 }

</bundles_post_ra>
